<compile_context>
chip_gen: v5e
topology: v5e:2x2
jax: 0.10.0
libtpu: 0.0.40
codegen_flags: <defaults>
</compile_context>

<pallas_src>
import functools

import jax
import jax.numpy as jnp
from jax.experimental import pallas as pl
from jax.experimental.pallas import tpu as pltpu

C_HID1 = 512      # conv1 out channels
C_HID2 = 64       # conv2 out channels
HID_CHUNK = 128   # hidden-dim chunk so the (hid, tile) intermediate stays small


def _attention2d_kernel(x_ref, w1_ref, b1_ref, w2_ref, b2_ref, w3_ref, b3_ref,
                        out_ref, attn_ref):
    # x_ref: (Cin, T) channels-first tile — tokens live on the 128-lane axis.
    x = x_ref[...]                        # f32, kept full precision for the gate
    x_bf = x.astype(jnp.bfloat16)         # bf16 MXU operand

    # --- layers 1+2 fused, chunked over the 512 hidden channels -------------
    # per chunk: MXU (chunk,Cin)@(Cin,T) -> one fused bias+ReLU+bf16 pass ->
    #            MXU (64,chunk)@(chunk,T), accumulated into f32 h2.
    h2 = None
    for lo in range(0, C_HID1, HID_CHUNK):
        hi = lo + HID_CHUNK
        h1c = jnp.dot(w1_ref[lo:hi, :], x_bf,
                      preferred_element_type=jnp.float32)           # (chunk, T)
        h1c = jnp.maximum(h1c + b1_ref[lo:hi, :], 0.0).astype(jnp.bfloat16)
        p = jnp.dot(w2_ref[:, lo:hi], h1c,
                    preferred_element_type=jnp.float32)              # (64, T)
        h2 = p if h2 is None else h2 + p
    h2 = jnp.maximum(h2 + b2_ref[...], 0.0)                          # (64, T) f32

    # --- layer 3: 1x1 conv, 64 -> 1 ------------------------------------------
    # N=1 MXU matmul wastes 255/256 result columns; VPU multiply + sublane
    # (XLU) reduction instead.
    logits = jnp.sum(h2 * w3_ref[...], axis=0, keepdims=True) + b3_ref[0, 0]
    attn = jax.nn.sigmoid(logits)                                    # (1, T)

    attn_ref[...] = attn.astype(attn_ref.dtype)
    out_ref[...] = (x * attn).astype(out_ref.dtype)   # gate, broadcast over C


@functools.partial(jax.jit, static_argnames=("tile_m",))
def attention2d(features, w1, b1, w2, b2, w3, b3, *, tile_m=2048):
    """features: (B, C, H, W) float32 (NCHW, like the PyTorch module).

    Weights are PyTorch Conv2d weights with the 1x1 spatial dims squeezed:
      w1 (512, C), b1 (512, 1), w2 (64, 512), b2 (64, 1), w3 (64, 1), b3 (1, 1).
    """
    B, C, H, W = features.shape
    hw = H * W

    # Channels-first "tokens on lanes": free reshape, no NCHW<->NHWC transpose.
    x = features.reshape(B, C, hw)

    # Pre-cast the two matmul weights to bf16 once (MXU bf16 path, f32
    # accumulation in-kernel).  Biases and w3 stay f32.
    w1 = w1.astype(jnp.bfloat16)
    w2 = w2.astype(jnp.bfloat16)

    # Lane-aligned token tile (multiple of 128).  No padding: the grid uses
    # cdiv; Pallas masks the ragged last block (all compute is column-local).
    tile_m = max(128, (tile_m // 128) * 128)
    hw_lanes = pl.cdiv(hw, 128) * 128
    tile = min(tile_m, hw_lanes)
    if B == 1 and hw_lanes >= 256:
        # v7x megacore: keep >=2 independent grid steps so both TCs get work.
        tile = min(tile, max(128, ((hw_lanes // 2) // 128) * 128))

    grid = (B, pl.cdiv(hw, tile))

    n_tok = B * hw
    cost = pl.CostEstimate(
        flops=2 * n_tok * (C * C_HID1 + C_HID1 * C_HID2 + C_HID2) + n_tok * C,
        transcendentals=n_tok,
        bytes_accessed=(4 * (2 * n_tok * C + n_tok)                  # x, out, attn
                        + 2 * (C_HID1 * C + C_HID2 * C_HID1)         # bf16 weights
                        + 4 * (C_HID1 + C_HID2 + C_HID2 + 1)),       # biases, w3
    )

    out, attn = pl.pallas_call(
        _attention2d_kernel,
        out_shape=(
            jax.ShapeDtypeStruct((B, C, hw), features.dtype),
            jax.ShapeDtypeStruct((B, 1, hw), features.dtype),
        ),
        grid=grid,
        in_specs=[
            pl.BlockSpec((None, C, tile), lambda b, i: (b, 0, i)),      # x
            pl.BlockSpec((C_HID1, C), lambda b, i: (0, 0)),             # w1 (bf16)
            pl.BlockSpec((C_HID1, 1), lambda b, i: (0, 0)),             # b1 (f32)
            pl.BlockSpec((C_HID2, C_HID1), lambda b, i: (0, 0)),        # w2 (bf16)
            pl.BlockSpec((C_HID2, 1), lambda b, i: (0, 0)),             # b2 (f32)
            pl.BlockSpec((C_HID2, 1), lambda b, i: (0, 0)),             # w3 (f32)
            pl.BlockSpec(memory_space=pltpu.MemorySpace.SMEM),          # b3 scalar
        ],
        out_specs=(
            pl.BlockSpec((None, C, tile), lambda b, i: (b, 0, i)),      # out
            pl.BlockSpec((None, 1, tile), lambda b, i: (b, 0, i)),      # attn
        ),
        # Both grid axes are independent -> megacore/TC sharding.  32 MiB
        # scoped VMEM comfortably covers the chunked intermediates
        # (HID_CHUNK*tile f32+bf16 ~ 1.5 MiB, h2 0.5 MiB at tile=2048) plus
        # double-buffered I/O on every generation (v5e 16 MiB default,
        # v7x 64 MiB physical).
        compiler_params=pltpu.CompilerParams(
            dimension_semantics=("parallel", "parallel"),
            vmem_limit_bytes=32 * 1024 * 1024,
        ),
        cost_estimate=cost,
    )(x, w1, b1, w2, b2, w3, b3)

    return out.reshape(B, C, H, W), attn.reshape(B, 1, H, W)


def init_params(key, in_channels):
    """Deterministic init matching Conv2d weight shapes (out, in) squeezed."""
    k1, k2, k3, k4, k5, k6 = jax.random.split(key, 6)
    w1 = jax.random.normal(k1, (C_HID1, in_channels), jnp.float32) * 0.05
    b1 = jax.random.normal(k2, (C_HID1, 1), jnp.float32) * 0.05
    w2 = jax.random.normal(k3, (C_HID2, C_HID1), jnp.float32) * 0.05
    b2 = jax.random.normal(k4, (C_HID2, 1), jnp.float32) * 0.05
    w3 = jax.random.normal(k5, (C_HID2, 1), jnp.float32) * 0.05
    b3 = jax.random.normal(k6, (1, 1), jnp.float32) * 0.05
    return w1, b1, w2, b2, w3, b3


def reference(features, w1, b1, w2, b2, w3, b3):
    """Plain-JAX f32 reference of the PyTorch forward (eval mode)."""
    B, C, H, W = features.shape
    x = features.reshape(B, C, H * W)
    h1 = jnp.maximum(jnp.einsum("oc,bct->bot", w1, x) + b1[None], 0.0)
    h2 = jnp.maximum(jnp.einsum("os,bst->bot", w2, h1) + b2[None], 0.0)
    logits = jnp.einsum("s,bst->bt", w3[:, 0], h2)[:, None, :] + b3[0, 0]
    attn = jax.nn.sigmoid(logits)
    out = x * attn
    return out.reshape(B, C, H, W), attn.reshape(B, 1, H, W)


if __name__ == "__main__":
    key = jax.random.PRNGKey(0)
    k_x, k_p = jax.random.split(key)

    B, C, H, W = 2, 4, 16, 16
    features = jax.random.normal(k_x, (B, C, H, W), jnp.float32)
    params = init_params(k_p, C)

    out, attn = attention2d(features, *params)
    out, attn = jax.block_until_ready((out, attn))

    ref_out, ref_attn = reference(features, *params)
    assert out.shape == (B, C, H, W) and attn.shape == (B, 1, H, W)
    # bf16 MXU operands (f32 accumulation) => relax tolerance vs the f32 ref.
    assert jnp.allclose(out, ref_out, atol=1e-2, rtol=1e-2)
    assert jnp.allclose(attn, ref_attn, atol=1e-2, rtol=1e-2)

    print("KERNEL_OK")
</pallas_src>

<mosaic_0001>
module attributes {stable_mosaic.version = 11 : i64} {
  func.func @_attention2d_kernel(%arg0: i32, %arg1: i32, %arg2: memref<1x4x256xf32, #tpu.memory_space<vmem>>, %arg3: memref<512x4xbf16, #tpu.memory_space<vmem>>, %arg4: memref<512x1xf32, #tpu.memory_space<vmem>>, %arg5: memref<64x512xbf16, #tpu.memory_space<vmem>>, %arg6: memref<64x1xf32, #tpu.memory_space<vmem>>, %arg7: memref<64x1xf32, #tpu.memory_space<vmem>>, %arg8: memref<1x1xf32, #tpu.memory_space<smem>>, %arg9: memref<1x4x256xf32, #tpu.memory_space<vmem>>, %arg10: memref<1x1x256xf32, #tpu.memory_space<vmem>>) attributes {dimension_semantics = [#tpu.dimension_semantics<parallel>, #tpu.dimension_semantics<parallel>], iteration_bounds = array<i64: 2, 1>, scalar_prefetch = 0 : i64, scratch_operands = 0 : i64, tpu.core_type = #tpu.core_type<tc>, window_params = [{transform_indices = @transform_0, window_bounds = array<i64: 1, 4, 256>}, {pipeline_mode = #tpu.pipeline_mode<synchronous>, transform_indices = @transform_1, window_bounds = array<i64: 512, 4>}, {pipeline_mode = #tpu.pipeline_mode<synchronous>, transform_indices = @transform_2, window_bounds = array<i64: 512, 1>}, {pipeline_mode = #tpu.pipeline_mode<synchronous>, transform_indices = @transform_3, window_bounds = array<i64: 64, 512>}, {pipeline_mode = #tpu.pipeline_mode<synchronous>, transform_indices = @transform_4, window_bounds = array<i64: 64, 1>}, {pipeline_mode = #tpu.pipeline_mode<synchronous>, transform_indices = @transform_5, window_bounds = array<i64: 64, 1>}, {transform_indices = @transform_6, window_bounds = array<i64: 1, 1>}, {transform_indices = @transform_7, window_bounds = array<i64: 1, 4, 256>}, {transform_indices = @transform_8, window_bounds = array<i64: 1, 1, 256>}]} {
    %c0 = arith.constant 0 : index
    %c0_0 = arith.constant 0 : index
    %c0_1 = arith.constant 0 : index
    %0 = vector.load %arg2[%c0, %c0_0, %c0_1] : memref<1x4x256xf32, #tpu.memory_space<vmem>>, vector<1x4x256xf32>
    %1 = vector.shape_cast %0 : vector<1x4x256xf32> to vector<4x256xf32>
    %2 = arith.truncf %1 : vector<4x256xf32> to vector<4x256xbf16>
    %c0_2 = arith.constant 0 : index
    %c0_3 = arith.constant 0 : index
    %3 = vector.load %arg3[%c0_2, %c0_3] : memref<512x4xbf16, #tpu.memory_space<vmem>>, vector<128x4xbf16>
    %cst = arith.constant dense<0.000000e+00> : vector<128x256xf32>
    %4 = tpu.matmul %3, %2, %cst {dimension_numbers = #tpu.dot_dimension_numbers<[1], [0], [0], [1], [0, 0, 1, 1], [], []>} : vector<128x4xbf16>, vector<4x256xbf16>, vector<128x256xf32> -> vector<128x256xf32>
    %c0_4 = arith.constant 0 : index
    %c0_5 = arith.constant 0 : index
    %5 = vector.load %arg4[%c0_4, %c0_5] : memref<512x1xf32, #tpu.memory_space<vmem>>, vector<128x1xf32>
    %6 = vector.broadcast %5 : vector<128x1xf32> to vector<128x256xf32>
    %7 = arith.addf %4, %6 : vector<128x256xf32>
    %cst_6 = arith.constant 0.000000e+00 : f32
    %8 = vector.broadcast %cst_6 : f32 to vector<128x256xf32>
    %9 = arith.maximumf %7, %8 : vector<128x256xf32>
    %10 = arith.truncf %9 : vector<128x256xf32> to vector<128x256xbf16>
    %c0_7 = arith.constant 0 : index
    %c0_8 = arith.constant 0 : index
    %11 = vector.load %arg5[%c0_7, %c0_8] : memref<64x512xbf16, #tpu.memory_space<vmem>>, vector<64x128xbf16>
    %cst_9 = arith.constant dense<0.000000e+00> : vector<64x256xf32>
    %12 = tpu.matmul %11, %10, %cst_9 {dimension_numbers = #tpu.dot_dimension_numbers<[1], [0], [0], [1], [0, 0, 1, 1], [], []>} : vector<64x128xbf16>, vector<128x256xbf16>, vector<64x256xf32> -> vector<64x256xf32>
    %c128 = arith.constant 128 : index
    %c0_10 = arith.constant 0 : index
    %13 = vector.load %arg3[%c128, %c0_10] : memref<512x4xbf16, #tpu.memory_space<vmem>>, vector<128x4xbf16>
    %cst_11 = arith.constant dense<0.000000e+00> : vector<128x256xf32>
    %14 = tpu.matmul %13, %2, %cst_11 {dimension_numbers = #tpu.dot_dimension_numbers<[1], [0], [0], [1], [0, 0, 1, 1], [], []>} : vector<128x4xbf16>, vector<4x256xbf16>, vector<128x256xf32> -> vector<128x256xf32>
    %c128_12 = arith.constant 128 : index
    %c0_13 = arith.constant 0 : index
    %15 = vector.load %arg4[%c128_12, %c0_13] : memref<512x1xf32, #tpu.memory_space<vmem>>, vector<128x1xf32>
    %16 = vector.broadcast %15 : vector<128x1xf32> to vector<128x256xf32>
    %17 = arith.addf %14, %16 : vector<128x256xf32>
    %cst_14 = arith.constant 0.000000e+00 : f32
    %18 = vector.broadcast %cst_14 : f32 to vector<128x256xf32>
    %19 = arith.maximumf %17, %18 : vector<128x256xf32>
    %20 = arith.truncf %19 : vector<128x256xf32> to vector<128x256xbf16>
    %c0_15 = arith.constant 0 : index
    %c128_16 = arith.constant 128 : index
    %21 = vector.load %arg5[%c0_15, %c128_16] : memref<64x512xbf16, #tpu.memory_space<vmem>>, vector<64x128xbf16>
    %cst_17 = arith.constant dense<0.000000e+00> : vector<64x256xf32>
    %22 = tpu.matmul %21, %20, %cst_17 {dimension_numbers = #tpu.dot_dimension_numbers<[1], [0], [0], [1], [0, 0, 1, 1], [], []>} : vector<64x128xbf16>, vector<128x256xbf16>, vector<64x256xf32> -> vector<64x256xf32>
    %23 = arith.addf %12, %22 : vector<64x256xf32>
    %c256 = arith.constant 256 : index
    %c0_18 = arith.constant 0 : index
    %24 = vector.load %arg3[%c256, %c0_18] : memref<512x4xbf16, #tpu.memory_space<vmem>>, vector<128x4xbf16>
    %cst_19 = arith.constant dense<0.000000e+00> : vector<128x256xf32>
    %25 = tpu.matmul %24, %2, %cst_19 {dimension_numbers = #tpu.dot_dimension_numbers<[1], [0], [0], [1], [0, 0, 1, 1], [], []>} : vector<128x4xbf16>, vector<4x256xbf16>, vector<128x256xf32> -> vector<128x256xf32>
    %c256_20 = arith.constant 256 : index
    %c0_21 = arith.constant 0 : index
    %26 = vector.load %arg4[%c256_20, %c0_21] : memref<512x1xf32, #tpu.memory_space<vmem>>, vector<128x1xf32>
    %27 = vector.broadcast %26 : vector<128x1xf32> to vector<128x256xf32>
    %28 = arith.addf %25, %27 : vector<128x256xf32>
    %cst_22 = arith.constant 0.000000e+00 : f32
    %29 = vector.broadcast %cst_22 : f32 to vector<128x256xf32>
    %30 = arith.maximumf %28, %29 : vector<128x256xf32>
    %31 = arith.truncf %30 : vector<128x256xf32> to vector<128x256xbf16>
    %c0_23 = arith.constant 0 : index
    %c256_24 = arith.constant 256 : index
    %32 = vector.load %arg5[%c0_23, %c256_24] : memref<64x512xbf16, #tpu.memory_space<vmem>>, vector<64x128xbf16>
    %cst_25 = arith.constant dense<0.000000e+00> : vector<64x256xf32>
    %33 = tpu.matmul %32, %31, %cst_25 {dimension_numbers = #tpu.dot_dimension_numbers<[1], [0], [0], [1], [0, 0, 1, 1], [], []>} : vector<64x128xbf16>, vector<128x256xbf16>, vector<64x256xf32> -> vector<64x256xf32>
    %34 = arith.addf %23, %33 : vector<64x256xf32>
    %c384 = arith.constant 384 : index
    %c0_26 = arith.constant 0 : index
    %35 = vector.load %arg3[%c384, %c0_26] : memref<512x4xbf16, #tpu.memory_space<vmem>>, vector<128x4xbf16>
    %cst_27 = arith.constant dense<0.000000e+00> : vector<128x256xf32>
    %36 = tpu.matmul %35, %2, %cst_27 {dimension_numbers = #tpu.dot_dimension_numbers<[1], [0], [0], [1], [0, 0, 1, 1], [], []>} : vector<128x4xbf16>, vector<4x256xbf16>, vector<128x256xf32> -> vector<128x256xf32>
    %c384_28 = arith.constant 384 : index
    %c0_29 = arith.constant 0 : index
    %37 = vector.load %arg4[%c384_28, %c0_29] : memref<512x1xf32, #tpu.memory_space<vmem>>, vector<128x1xf32>
    %38 = vector.broadcast %37 : vector<128x1xf32> to vector<128x256xf32>
    %39 = arith.addf %36, %38 : vector<128x256xf32>
    %cst_30 = arith.constant 0.000000e+00 : f32
    %40 = vector.broadcast %cst_30 : f32 to vector<128x256xf32>
    %41 = arith.maximumf %39, %40 : vector<128x256xf32>
    %42 = arith.truncf %41 : vector<128x256xf32> to vector<128x256xbf16>
    %c0_31 = arith.constant 0 : index
    %c384_32 = arith.constant 384 : index
    %43 = vector.load %arg5[%c0_31, %c384_32] : memref<64x512xbf16, #tpu.memory_space<vmem>>, vector<64x128xbf16>
    %cst_33 = arith.constant dense<0.000000e+00> : vector<64x256xf32>
    %44 = tpu.matmul %43, %42, %cst_33 {dimension_numbers = #tpu.dot_dimension_numbers<[1], [0], [0], [1], [0, 0, 1, 1], [], []>} : vector<64x128xbf16>, vector<128x256xbf16>, vector<64x256xf32> -> vector<64x256xf32>
    %45 = arith.addf %34, %44 : vector<64x256xf32>
    %c0_34 = arith.constant 0 : index
    %c0_35 = arith.constant 0 : index
    %46 = vector.load %arg6[%c0_34, %c0_35] : memref<64x1xf32, #tpu.memory_space<vmem>>, vector<64x1xf32>
    %47 = vector.broadcast %46 : vector<64x1xf32> to vector<64x256xf32>
    %48 = arith.addf %45, %47 : vector<64x256xf32>
    %cst_36 = arith.constant 0.000000e+00 : f32
    %49 = vector.broadcast %cst_36 : f32 to vector<64x256xf32>
    %50 = arith.maximumf %48, %49 : vector<64x256xf32>
    %c0_37 = arith.constant 0 : index
    %c0_38 = arith.constant 0 : index
    %51 = vector.load %arg7[%c0_37, %c0_38] : memref<64x1xf32, #tpu.memory_space<vmem>>, vector<64x1xf32>
    %52 = vector.broadcast %51 : vector<64x1xf32> to vector<64x256xf32>
    %53 = arith.mulf %50, %52 : vector<64x256xf32>
    %cst_39 = arith.constant dense<0.000000e+00> : vector<256xf32>
    %54 = vector.multi_reduction <add>, %53, %cst_39 [0] : vector<64x256xf32> to vector<256xf32>
    %55 = vector.shape_cast %54 : vector<256xf32> to vector<1x256xf32>
    %c0_40 = arith.constant 0 : index
    %c0_41 = arith.constant 0 : index
    %56 = memref.load %arg8[%c0_40, %c0_41] : memref<1x1xf32, #tpu.memory_space<smem>>
    %57 = vector.broadcast %56 : f32 to vector<1x256xf32>
    %58 = arith.addf %55, %57 : vector<1x256xf32>
    %59 = arith.negf %58 : vector<1x256xf32>
    %60 = math.exp %59 : vector<1x256xf32>
    %cst_42 = arith.constant 1.000000e+00 : f32
    %61 = vector.broadcast %cst_42 : f32 to vector<1x256xf32>
    %62 = arith.addf %61, %60 : vector<1x256xf32>
    %63 = arith.divf %61, %62 : vector<1x256xf32>
    %c0_43 = arith.constant 0 : index
    %c0_44 = arith.constant 0 : index
    %c0_45 = arith.constant 0 : index
    %64 = vector.load %arg10[%c0_43, %c0_44, %c0_45] : memref<1x1x256xf32, #tpu.memory_space<vmem>>, vector<1x1x256xf32>
    %65 = vector.shape_cast %64 : vector<1x1x256xf32> to vector<1x256xf32>
    %66 = vector.shape_cast %63 : vector<1x256xf32> to vector<1x1x256xf32>
    tpu.vector_store %arg10[%c0_43, %c0_44, %c0_45], %66 {strides = array<i32>} : memref<1x1x256xf32, #tpu.memory_space<vmem>>, vector<1x1x256xf32>,
    %67 = vector.broadcast %63 : vector<1x256xf32> to vector<4x256xf32>
    %68 = arith.mulf %1, %67 : vector<4x256xf32>
    %c0_46 = arith.constant 0 : index
    %c0_47 = arith.constant 0 : index
    %c0_48 = arith.constant 0 : index
    %69 = vector.load %arg9[%c0_46, %c0_47, %c0_48] : memref<1x4x256xf32, #tpu.memory_space<vmem>>, vector<1x4x256xf32>
    %70 = vector.shape_cast %69 : vector<1x4x256xf32> to vector<4x256xf32>
    %71 = vector.shape_cast %68 : vector<4x256xf32> to vector<1x4x256xf32>
    tpu.vector_store %arg9[%c0_46, %c0_47, %c0_48], %71 {strides = array<i32>} : memref<1x4x256xf32, #tpu.memory_space<vmem>>, vector<1x4x256xf32>,
    return
  }
  func.func @transform_0(%arg0: i32, %arg1: i32) -> (i32, i32, i32) {
    %c0_i32 = arith.constant 0 : i32
    %c0_i32_0 = arith.constant 0 : i32
    return %arg0, %c0_i32, %arg1 : i32, i32, i32
  }
  func.func @transform_1(%arg0: i32, %arg1: i32) -> (i32, i32) {
    %c0_i32 = arith.constant 0 : i32
    %c0_i32_0 = arith.constant 0 : i32
    %c0_i32_1 = arith.constant 0 : i32
    return %c0_i32, %c0_i32_0 : i32, i32
  }
  func.func @transform_2(%arg0: i32, %arg1: i32) -> (i32, i32) {
    %c0_i32 = arith.constant 0 : i32
    %c0_i32_0 = arith.constant 0 : i32
    %c0_i32_1 = arith.constant 0 : i32
    return %c0_i32, %c0_i32_0 : i32, i32
  }
  func.func @transform_3(%arg0: i32, %arg1: i32) -> (i32, i32) {
    %c0_i32 = arith.constant 0 : i32
    %c0_i32_0 = arith.constant 0 : i32
    %c0_i32_1 = arith.constant 0 : i32
    return %c0_i32, %c0_i32_0 : i32, i32
  }
  func.func @transform_4(%arg0: i32, %arg1: i32) -> (i32, i32) {
    %c0_i32 = arith.constant 0 : i32
    %c0_i32_0 = arith.constant 0 : i32
    %c0_i32_1 = arith.constant 0 : i32
    return %c0_i32, %c0_i32_0 : i32, i32
  }
  func.func @transform_5(%arg0: i32, %arg1: i32) -> (i32, i32) {
    %c0_i32 = arith.constant 0 : i32
    %c0_i32_0 = arith.constant 0 : i32
    %c0_i32_1 = arith.constant 0 : i32
    return %c0_i32, %c0_i32_0 : i32, i32
  }
  func.func @transform_6(%arg0: i32, %arg1: i32) -> (i32, i32) {
    %c0_i32 = arith.constant 0 : i32
    %c0_i32_0 = arith.constant 0 : i32
    %c0_i32_1 = arith.constant 0 : i32
    return %c0_i32, %c0_i32_0 : i32, i32
  }
  func.func @transform_7(%arg0: i32, %arg1: i32) -> (i32, i32, i32) {
    %c0_i32 = arith.constant 0 : i32
    %c0_i32_0 = arith.constant 0 : i32
    return %arg0, %c0_i32, %arg1 : i32, i32, i32
  }
  func.func @transform_8(%arg0: i32, %arg1: i32) -> (i32, i32, i32) {
    %c0_i32 = arith.constant 0 : i32
    %c0_i32_0 = arith.constant 0 : i32
    return %arg0, %c0_i32, %arg1 : i32, i32, i32
  }
}

</mosaic_0001>

<bundles_post_ra>
// kernel: attention2d.1
= control target key start
LH: loop header
LB: loop body
LE: loop exit
PB: predicated region body
PF: predicated region fallthrough
CT: control target
= control target key end

     0   :  { %s2855_s29 = smov 0   ;;  %s2857_s30 = smov 0   ;;  %s3926_s0 = inlined_call_operand.vmem [shape: f32[2,4,256], index: 0, kind: input, shape index: {}]   ;;  %s3927_s1 = inlined_call_operand.vmem [shape: bf16[512,4], index: 1, kind: input, shape index: {}]   ;;  %s3928_s2 = inlined_call_operand.vmem [shape: f32[512,1], index: 2, kind: input, shape index: {}]   ;;  %s3929_s3 = inlined_call_operand.vmem [shape: bf16[64,512], index: 3, kind: input, shape index: {}]   ;;  %s3930_s4 = inlined_call_operand.vmem [shape: f32[64,1], index: 4, kind: input, shape index: {}]   ;;  %s3931_s5 = inlined_call_operand.vmem [shape: f32[64,1], index: 5, kind: input, shape index: {}]   ;;  %s3932_s6 = inlined_call_operand.<no memory space> [shape: f32[1,1], index: 6, kind: input, shape index: {}]   ;;  %s3933_s7 = inlined_call_operand.vmem [shape: f32[2,4,256], index: 7, kind: output, shape index: {0}]   ;;  %s3934_s8 = inlined_call_operand.vmem [shape: f32[2,1,256], index: 8, kind: output, shape index: {1}]  }
   0x1   :  { %14 = sst [smem:[#allocation2]] %s3932_s6  ;;  %s2859_s9 = smov 0  }
   0x2 LB: > { %s32_s6 = sadd.s32 1, %s2800_s30  ;;  %p2430_p0 = scmp.ge.s32.totalorder %s2804_s9, 1  ;;  %s2804_s9 = sphi %s2859_s9, %s20_s9   ;;  %s2800_s30 = sphi %s2857_s30, %s4066_s30   ;;  %s2796_s29 = sphi %s2855_s29, %s4065_s29  }
   0x3   : > { %p34_p1 = scmp.ge.s32.totalorder %s32_s6, 2  ;;  %p289_p2 = scmp.lt.s32.totalorder %s2804_s9, 3 }
   0x5   : > { %s4068_s6 = smov (%p34_p1, %s32_s6), 0  ;;  %p290_p3 = pnand %p2430_p0, %p289_p2 }
   0x7   : > { %293 = sbr.rel (%p290_p3) target bundleno = 1265 (0x4f1), region = 48 }
   0xc   : > { %v742_v0 = vld [vmem:[%s3928_s2 + $0xd0] sm:$0xff]  ;;  %v744_v1 = vld [vmem:[%s3928_s2 + $0xe0] sm:$0xff]  ;;  %p340_p4 = scmp.lt.s32.totalorder %s2796_s29, 1  ;;  %v2806_v3 = vmov 0   ;;  %v743_v5 = vld [vmem:[%s3928_s2 + $0xd8] sm:$0xff]  ;;  %vm555_vm0 = vcmask 1041408  }
   0xd   : > { %v746_v2 = vld [vmem:[%s3928_s2 + $0xf0] sm:$0xff]  ;;  %2773 = vset.pattern.permute.xlu2 %v2806_v3  ;;  %2772 = vset.pattern.permute.xlu1 %v2806_v3  ;;  %v745_v6 = vld [vmem:[%s3928_s2 + $0xe8] sm:$0xff]  ;;  %v747_v7 = vld [vmem:[%s3928_s2 + $0xf8] sm:$0xff]  ;;  %vm530_vm1 = vcmask 31744   ;;  %s2236_s13 = sld [smem:[#allocation2]]  ;;  %vm2281_vm9 = vcmask 1040384  }
   0xe   : > { %2771 = vset.pattern.permute.xlu0 %v2806_v3  ;;  %800 = vperm.xlu2 %2773, %v742_v0   ;;  %s4070_s29 = smov (!%p340_p4, %s2796_s29), 1  ;;  %v738_v10 = vld [vmem:[%s3928_s2 + $0xb0] sm:$0xff]  ;;  %v741_v13 = vld [vmem:[%s3928_s2 + $0xc8] sm:$0xff]  ;;  %v740_v14 = vld [vmem:[%s3928_s2 + $0xc0] sm:$0xff]  ;;  %vm2290_vm10 = vcmask 1043456  }
   0xf   : > { %810 = vperm.xlu1 %2772, %v744_v1   ;;  %820 = vperm.xlu0 %2771, %v746_v2   ;;  %s2696_s16 = sshll.u32 %s4070_s29, 3  ;;  %v2698_v17 = vld [vmem:[%s3927_s1] sm:$0xff]  ;;  %v737_v19 = vld [vmem:[%s3928_s2 + $0xa8] sm:$0xff]  ;;  %v739_v21 = vld [vmem:[%s3928_s2 + $0xb8] sm:$0xff]  ;;  %s2435_s14 = sshll.u32 %s4070_s29, 1 }
  0x10   : > { %s347_s19 = scalar_lea.vmem %s3926_s0, %s2696_s16  ;;  %v2710_v18 = vld [vmem:[%s3927_s1 + $0x40] sm:$0xff]  ;;  %v735_v23 = vld [vmem:[%s3928_s2 + $0x98] sm:$0xff]  ;;  %v734_v24 = vld [vmem:[%s3928_s2 + $0x90] sm:$0xff]  ;;  %s366_s18 = scalar_lea.vmem %s3934_s8, %s2435_s14 }
  0x11   : > { %v2890_v4 = vld [vmem:[%s347_s19] sm:$0xff]  ;;  %v2699_v25 = vld [vmem:[%s3927_s1 + $0x8] sm:$0xff]  ;;  %v409_v27 = vld [vmem:[%s3928_s2 + $0x78] sm:$0xff]  ;;  %s357_s21 = scalar_lea.vmem %s3933_s7, %s2696_s16 }
  0x12   : > { %3953 = vst [vmem:[#allocation3_spill] sm:$0xff] %v2890_v4  ;;  %v736_v20 = vld [vmem:[%s3928_s2 + $0xa0] sm:$0xff]  ;;  %v2711_v26 = vld [vmem:[%s3927_s1 + $0x48] sm:$0xff]  ;;  %v408_v29 = vld [vmem:[%s3928_s2 + $0x70] sm:$0xff] }
  0x13   : > { %371 = vst [vmem:[#allocation1] ss:$2 sm:$0xff] %v2890_v4  ;;  %v732_v22 = vld [vmem:[%s3928_s2 + $0x80] sm:$0xff]  ;;  %v733_v28 = vld [vmem:[%s3928_s2 + $0x88] sm:$0xff]  ;;  %v404_v30 = vld [vmem:[%s3928_s2 + $0x50] sm:$0xff] }
  0x14   : > { %v407_v31 = vld [vmem:[%s3928_s2 + $0x68] sm:$0xff]  ;;  %v406_v32 = vld [vmem:[%s3928_s2 + $0x60] sm:$0xff]  ;;  %v2700_v33 = vld [vmem:[%s3927_s1 + $0x10] sm:$0xff] }
  0x15   : > { %v2712_v34 = vld [vmem:[%s3927_s1 + $0x50] sm:$0xff]  ;;  %v403_v35 = vld [vmem:[%s3928_s2 + $0x48] sm:$0xff]  ;;  %v405_v36 = vld [vmem:[%s3928_s2 + $0x58] sm:$0xff] }
  0x16   : > { %805 = vperm.xlu2 %2773, %v743_v5   ;;  %v402_v37 = vld [vmem:[%s3928_s2 + $0x40] sm:$0xff]  ;;  %v401_v39 = vld [vmem:[%s3928_s2 + $0x38] sm:$0xff]  ;;  %v400_v40 = vld [vmem:[%s3928_s2 + $0x30] sm:$0xff] }
  0x17   : > { %815 = vperm.xlu1 %2772, %v745_v6   ;;  %825 = vperm.xlu0 %2771, %v747_v7   ;;  %v398_v38 = vld [vmem:[%s3928_s2 + $0x20] sm:$0xff]  ;;  %v2701_v41 = vld [vmem:[%s3927_s1 + $0x18] sm:$0xff]  ;;  %v399_v44 = vld [vmem:[%s3928_s2 + $0x28] sm:$0xff] }
  0x18   : > { %v2713_v42 = vld [vmem:[%s3927_s1 + $0x58] sm:$0xff]  ;;  %v396_v45 = vld [vmem:[%s3928_s2 + $0x10] sm:$0xff]  ;;  %v395_v47 = vld [vmem:[%s3928_s2 + $0x8] sm:$0xff] }
  0x19   : > { %v397_v43 = vld [vmem:[%s3928_s2 + $0x18] sm:$0xff]  ;;  %v1240_v46 = vld [vmem:[%s3928_s2 + $0x170] sm:$0xff]  ;;  %v394_v48 = vld [vmem:[%s3928_s2] sm:$0xff] }
  0x1a   : > { %v372_v8 = vld.sshfl [vmem:[#allocation1] sm:$0xff pattern:$0x75316420]  ;;  %v373_v9 = vld.sshfl [vmem:[#allocation1 + $0x8] sm:$0xff pattern:$0x75316420] }
  0x1b   : > { %v376_v11 = vpack.c.bf16 %v372_v8, %v372_v8  ;;  %v377_v12 = vpack.c.bf16 %v373_v9, %v373_v9  ;;  %v2702_v49 = vld [vmem:[%s3927_s1 + $0x20] sm:$0xff]  ;;  %v1239_v51 = vld [vmem:[%s3928_s2 + $0x168] sm:$0xff]  ;;  %v1241_v53 = vld [vmem:[%s3928_s2 + $0x178] sm:$0xff] }
  0x1c   : > { %v2714_v50 = vld [vmem:[%s3927_s1 + $0x60] sm:$0xff]  ;;  %v1237_v55 = vld [vmem:[%s3928_s2 + $0x158] sm:$0xff]  ;;  %v1236_v56 = vld [vmem:[%s3928_s2 + $0x150] sm:$0xff] }
  0x1d   : > { %v2911_v15 = vsel %vm555_vm0, %v376_v11, 0  ;;  %v2913_v16 = vsel %vm555_vm0, %v377_v12, 0  ;;  %v1238_v52 = vld [vmem:[%s3928_s2 + $0x160] sm:$0xff]  ;;  %v2703_v57 = vld [vmem:[%s3927_s1 + $0x28] sm:$0xff]  ;;  %v1233_v59 = vld [vmem:[%s3928_s2 + $0x138] sm:$0xff] }
  0x1e   : > { %3954 = vst [vmem:[#allocation4_spill] sm:$0xff] %v2911_v15  ;;  %780 = vperm.xlu2 %2773, %v738_v10   ;;  %569 = vmatpush.bf16.msra.mxu0 %v2911_v15  ;;  %v1234_v54 = vld [vmem:[%s3928_s2 + $0x140] sm:$0xff]  ;;  %v2715_v58 = vld [vmem:[%s3927_s1 + $0x68] sm:$0xff]  ;;  %v1232_v60 = vld [vmem:[%s3928_s2 + $0x130] sm:$0xff] }
  0x1f   : > { %3955 = vst [vmem:[#allocation5_spill] sm:$0xff] %v2913_v16  ;;  %795 = vperm.xlu1 %2772, %v741_v13   ;;  %790 = vperm.xlu0 %2771, %v740_v14   ;;  %v1235_v61 = vld [vmem:[%s3928_s2 + $0x148] sm:$0xff]  ;;  %v1228_v62 = vld [vmem:[%s3928_s2 + $0x110] sm:$0xff]  ;;  %v1230_v0 = vld [vmem:[%s3928_s2 + $0x120] sm:$0xff] }
  0x20   : > { %618 = vmatpush.bf16.msra.mxu1 %v2913_v16  ;;  %899 = vmatpush.bf16.msra.mxu2 %v2911_v15  ;;  %v1231_v63 = vld [vmem:[%s3928_s2 + $0x128] sm:$0xff]  ;;  %v2704_v1 = vld [vmem:[%s3927_s1 + $0x30] sm:$0xff]  ;;  %v1226_v5 = vld [vmem:[%s3928_s2 + $0x100] sm:$0xff] }
  0x21   : > { %948 = vmatpush.bf16.msra.mxu3 %v2913_v16  ;;  %2468 = vmatmul.msk.bf16.vlgmr.msra.gmra.mxu0 %vm530_vm1, %v2698_v17  ;;  %v2716_v2 = vld [vmem:[%s3927_s1 + $0x70] sm:$0xff]  ;;  %v1227_v3 = vld [vmem:[%s3928_s2 + $0x108] sm:$0xff]  ;;  %v1229_v6 = vld [vmem:[%s3928_s2 + $0x118] sm:$0xff] }
  0x22   : > { %v1666_v7 = vld [vmem:[%s3928_s2 + $0x1e0] sm:$0xff]  ;;  %v1669_v8 = vld [vmem:[%s3928_s2 + $0x1f8] sm:$0xff]  ;;  %v1668_v9 = vld [vmem:[%s3928_s2 + $0x1f0] sm:$0xff] }
  0x23   : > { %2476 = vmatmul.msk.bf16.vlgmr.msra.gmra.mxu1 %vm530_vm1, %v2698_v17  ;;  %2516 = vmatmul.msk.bf16.vlgmr.msra.gmra.mxu2 %vm530_vm1, %v2710_v18  ;;  %v2705_v10 = vld [vmem:[%s3927_s1 + $0x38] sm:$0xff]  ;;  %v1664_v13 = vld [vmem:[%s3928_s2 + $0x1d0] sm:$0xff]  ;;  %v1667_v14 = vld [vmem:[%s3928_s2 + $0x1e8] sm:$0xff] }
  0x24   : > { %2524 = vmatmul.msk.bf16.vlgmr.msra.gmra.mxu3 %vm530_vm1, %v2710_v18  ;;  %v2717_v11 = vld [vmem:[%s3927_s1 + $0x78] sm:$0xff]  ;;  %v1660_v17 = vld [vmem:[%s3928_s2 + $0x1b0] sm:$0xff]  ;;  %v1663_v18 = vld [vmem:[%s3928_s2 + $0x1c8] sm:$0xff] }
  0x25   : > { %v1665_v12 = vld [vmem:[%s3928_s2 + $0x1d8] sm:$0xff] }
  0x26   : > { %775 = vperm.xlu2 %2773, %v737_v19   ;;  %v1662_v19 = vld [vmem:[%s3928_s2 + $0x1c0] sm:$0xff] }
  0x27   : > { %770 = vperm.xlu1 %2772, %v736_v20   ;;  %785 = vperm.xlu0 %2771, %v739_v21  }
  0x2e   : > { %750 = vperm.xlu2 %2773, %v732_v22   ;;  %v1659_v22 = vld [vmem:[%s3928_s2 + $0x1a8] sm:$0xff] }
  0x2f   : > { %765 = vperm.xlu1 %2772, %v735_v23   ;;  %760 = vperm.xlu0 %2771, %v734_v24   ;;  %v1658_v23 = vld [vmem:[%s3928_s2 + $0x1a0] sm:$0xff]  ;;  %v1661_v24 = vld [vmem:[%s3928_s2 + $0x1b8] sm:$0xff] }
  0x31   : > { %2469 = vmatmul.msk.bf16.gmra.mxu0 %vm530_vm1, %v2699_v25 }
  0x33   : > { %2477 = vmatmul.msk.bf16.gmra.mxu1 %vm530_vm1, %v2699_v25  ;;  %2517 = vmatmul.msk.bf16.gmra.mxu2 %vm530_vm1, %v2711_v26 }
  0x34   : > { %2525 = vmatmul.msk.bf16.gmra.mxu3 %vm530_vm1, %v2711_v26 }
  0x36   : > { %487 = vperm.xlu2 %2773, %v409_v27  }
  0x37   : > { %755 = vperm.xlu0 %2771, %v733_v28   ;;  %482 = vperm.xlu1 %2772, %v408_v29   ;;  %v1654_v29 = vld [vmem:[%s3928_s2 + $0x180] sm:$0xff] }
  0x3e   : > { %462 = vperm.xlu2 %2773, %v404_v30   ;;  %v1657_v30 = vld [vmem:[%s3928_s2 + $0x198] sm:$0xff] }
  0x3f   : > { %477 = vperm.xlu1 %2772, %v407_v31   ;;  %472 = vperm.xlu0 %2771, %v406_v32   ;;  %v1656_v31 = vld [vmem:[%s3928_s2 + $0x190] sm:$0xff] }
  0x41   : > { %2470 = vmatmul.msk.bf16.gmra.mxu0 %vm530_vm1, %v2700_v33 }
  0x43   : > { %2478 = vmatmul.msk.bf16.gmra.mxu1 %vm530_vm1, %v2700_v33  ;;  %2518 = vmatmul.msk.bf16.gmra.mxu2 %vm530_vm1, %v2712_v34 }
  0x44   : > { %2526 = vmatmul.msk.bf16.gmra.mxu3 %vm530_vm1, %v2712_v34 }
  0x46   : > { %457 = vperm.xlu2 %2773, %v403_v35  }
  0x47   : > { %467 = vperm.xlu0 %2771, %v405_v36   ;;  %452 = vperm.xlu1 %2772, %v402_v37   ;;  %v2067_v36 = vld [vmem:[%s3930_s4 + $0x8] sm:$0xff]  ;;  %v2066_v37 = vld [vmem:[%s3930_s4] sm:$0xff] }
  0x4e   : > { %432 = vperm.xlu2 %2773, %v398_v38   ;;  %v1655_v38 = vld [vmem:[%s3928_s2 + $0x188] sm:$0xff] }
  0x4f   : > { %447 = vperm.xlu1 %2772, %v401_v39   ;;  %442 = vperm.xlu0 %2771, %v400_v40  }
  0x51   : > { %2471 = vmatmul.msk.bf16.gmra.mxu0 %vm530_vm1, %v2701_v41 }
  0x53   : > { %2479 = vmatmul.msk.bf16.gmra.mxu1 %vm530_vm1, %v2701_v41  ;;  %2519 = vmatmul.msk.bf16.gmra.mxu2 %vm530_vm1, %v2713_v42 }
  0x54   : > { %2527 = vmatmul.msk.bf16.gmra.mxu3 %vm530_vm1, %v2713_v42 }
  0x56   : > { %427 = vperm.xlu2 %2773, %v397_v43  }
  0x57   : > { %437 = vperm.xlu0 %2771, %v399_v44   ;;  %422 = vperm.xlu1 %2772, %v396_v45  }
  0x5e   : > { %1314 = vperm.xlu2 %2773, %v1240_v46   ;;  %v2146_v46 = vld [vmem:[%s3931_s5] sm:$0xff] }
  0x5f   : > { %417 = vperm.xlu1 %2772, %v395_v47   ;;  %412 = vperm.xlu0 %2771, %v394_v48   ;;  %v2069_v47 = vld [vmem:[%s3930_s4 + $0x18] sm:$0xff]  ;;  %v2068_v48 = vld [vmem:[%s3930_s4 + $0x10] sm:$0xff] }
  0x61   : > { %2472 = vmatmul.msk.bf16.gmra.mxu0 %vm530_vm1, %v2702_v49 }
  0x63   : > { %2480 = vmatmul.msk.bf16.gmra.mxu1 %vm530_vm1, %v2702_v49  ;;  %2520 = vmatmul.msk.bf16.gmra.mxu2 %vm530_vm1, %v2714_v50 }
  0x64   : > { %2528 = vmatmul.msk.bf16.gmra.mxu3 %vm530_vm1, %v2714_v50 }
  0x66   : > { %1309 = vperm.xlu2 %2773, %v1239_v51  }
  0x67   : > { %1304 = vperm.xlu1 %2772, %v1238_v52   ;;  %1319 = vperm.xlu0 %2771, %v1241_v53  }
  0x68   : > { %v3190_v39 = vpop.permute.xlu2 %800 }
  0x6e   : > { %1284 = vperm.xlu2 %2773, %v1234_v54  }
  0x6f   : > { %1299 = vperm.xlu1 %2772, %v1237_v55   ;;  %1294 = vperm.xlu0 %2771, %v1236_v56   ;;  %v2148_v55 = vld [vmem:[%s3931_s5 + $0x10] sm:$0xff]  ;;  %v2070_v56 = vld [vmem:[%s3930_s4 + $0x20] sm:$0xff] }
  0x70   : > { %v3217_v51 = vpop.permute.xlu2 %805 }
  0x71   : > { %2473 = vmatmul.msk.bf16.gmra.mxu0 %vm530_vm1, %v2703_v57 }
  0x73   : > { %2481 = vmatmul.msk.bf16.gmra.mxu1 %vm530_vm1, %v2703_v57  ;;  %2521 = vmatmul.msk.bf16.gmra.mxu2 %vm530_vm1, %v2715_v58  ;;  %v2147_v57 = vld [vmem:[%s3931_s5 + $0x8] sm:$0xff] }
  0x74   : > { %2529 = vmatmul.msk.bf16.gmra.mxu3 %vm530_vm1, %v2715_v58 }
  0x76   : > { %1279 = vperm.xlu2 %2773, %v1233_v59  }
  0x77   : > { %1274 = vperm.xlu1 %2772, %v1232_v60   ;;  %1289 = vperm.xlu0 %2771, %v1235_v61  }
  0x7e   : > { %1254 = vperm.xlu2 %2773, %v1228_v62  }
  0x7f   : > { %1269 = vperm.xlu1 %2772, %v1231_v63   ;;  %1264 = vperm.xlu0 %2771, %v1230_v0   ;;  %v3244_v63 = vpop.permute.xlu2 %780  ;;  %v2072_v0 = vld [vmem:[%s3930_s4 + $0x30] sm:$0xff] }
  0x80   : > { %3970 = vst [vmem:[#allocation20_spill] sm:$0xff] %v3244_v63 }
  0x81   : > { %2474 = vmatmul.msk.bf16.gmra.mxu0 %vm530_vm1, %v2704_v1  ;;  %v3200_v44 = vpop.permute.xlu1 %810  ;;  %v3202_v45 = vpop.permute.xlu0 %820 }
  0x83   : > { %2482 = vmatmul.msk.bf16.gmra.mxu1 %vm530_vm1, %v2704_v1  ;;  %2522 = vmatmul.msk.bf16.gmra.mxu2 %vm530_vm1, %v2716_v2  ;;  %v2149_v1 = vld [vmem:[%s3931_s5 + $0x18] sm:$0xff] }
  0x84   : > { %2530 = vmatmul.msk.bf16.gmra.mxu3 %vm530_vm1, %v2716_v2  ;;  %v2071_v2 = vld [vmem:[%s3930_s4 + $0x28] sm:$0xff] }
  0x86   : > { %1249 = vperm.xlu2 %2773, %v1227_v3  }
  0x87   : > { %1244 = vperm.xlu1 %2772, %v1226_v5   ;;  %1259 = vperm.xlu0 %2771, %v1229_v6  }
  0x89   : > { %v3223_v54 = vpop.permute.xlu1 %815  ;;  %v3234_v58 = vpop.permute.xlu0 %825 }
  0x8e   : > { %1732 = vperm.xlu2 %2773, %v1666_v7  }
  0x8f   : > { %1747 = vperm.xlu1 %2772, %v1669_v8   ;;  %1742 = vperm.xlu0 %2771, %v1668_v9  }
  0x91   : > { %2475 = vmatmul.msk.bf16.gmra.mxu0 %vm530_vm1, %v2705_v10  ;;  %v3255_v3 = vpop.permute.xlu1 %795  ;;  %v3261_v7 = vpop.permute.xlu0 %790 }
  0x92   : > { %3972 = vst [vmem:[#allocation22_spill] sm:$0xff] %v3261_v7 }
  0x93   : > { %2483 = vmatmul.msk.bf16.gmra.mxu1 %vm530_vm1, %v2705_v10  ;;  %2523 = vmatmul.msk.bf16.gmra.mxu2 %vm530_vm1, %v2717_v11  ;;  %v3267_v10 = vpop.permute.xlu2 %775 }
  0x94   : > { %2531 = vmatmul.msk.bf16.gmra.mxu3 %vm530_vm1, %v2717_v11  ;;  %3974 = vst [vmem:[#allocation24_spill] sm:$0xff] %v3267_v10  ;;  %v2151_v11 = vld [vmem:[%s3931_s5 + $0x28] sm:$0xff] }
  0x96   : > { %1727 = vperm.xlu2 %2773, %v1665_v12   ;;  %v2073_v12 = vld [vmem:[%s3930_s4 + $0x38] sm:$0xff] }
  0x97   : > { %1722 = vperm.xlu1 %2772, %v1664_v13   ;;  %1737 = vperm.xlu0 %2771, %v1667_v14   ;;  %v2150_v13 = vld [vmem:[%s3931_s5 + $0x20] sm:$0xff] }
  0x9e   : > { %1702 = vperm.xlu2 %2773, %v1660_v17   ;;  %v3143_v20 = vpop.f32.mrf.mxu0 }
  0x9f   : > { %3956 = vst [vmem:[#allocation6_spill] sm:$0xff] %v3143_v20  ;;  %1717 = vperm.xlu1 %2772, %v1663_v18   ;;  %1712 = vperm.xlu0 %2771, %v1662_v19   ;;  %v3282_v18 = vpop.permute.xlu1 %770 }
  0xa0   : > { %v3145_v21 = vpop.f32.mrf.mxu1  ;;  %3976 = vst [vmem:[#allocation26_spill] sm:$0xff] %v3282_v18 }
  0xa1   : > { %3957 = vst [vmem:[#allocation7_spill] sm:$0xff] %v3145_v21 }
  0xa6   : > { %v3156_v25 = vpop.f32.mrf.mxu2  ;;  %1697 = vperm.xlu2 %2773, %v1659_v22   ;;  %v3158_v26 = vpop.f32.mrf.mxu0 }
  0xa7   : > { %3958 = vst [vmem:[#allocation8_spill] sm:$0xff] %v3156_v25  ;;  %v3160_v27 = vpop.f32.mrf.mxu3  ;;  %1692 = vperm.xlu1 %2772, %v1658_v23   ;;  %1707 = vperm.xlu0 %2771, %v1661_v24   ;;  %v3288_v23 = vpop.permute.xlu0 %785  ;;  %v2153_v24 = vld [vmem:[%s3931_s5 + $0x38] sm:$0xff] }
  0xa8   : > { %3959 = vst [vmem:[#allocation9_spill] sm:$0xff] %v3158_v26  ;;  %v3162_v28 = vpop.f32.mrf.mxu1 }
  0xa9   : > { %3960 = vst [vmem:[#allocation10_spill] sm:$0xff] %v3160_v27 }
  0xaa   : > { %3961 = vst [vmem:[#allocation11_spill] sm:$0xff] %v3162_v28 }
  0xab   : > { %3978 = vst [vmem:[#allocation28_spill] sm:$0xff] %v3288_v23 }
  0xae   : > { %v3173_v32 = vpop.f32.mrf.mxu2  ;;  %1672 = vperm.xlu2 %2773, %v1654_v29   ;;  %v3175_v33 = vpop.f32.mrf.mxu0  ;;  %v2152_v29 = vld [vmem:[%s3931_s5 + $0x30] sm:$0xff] }
  0xaf   : > { %3962 = vst [vmem:[#allocation12_spill] sm:$0xff] %v3173_v32  ;;  %v3177_v34 = vpop.f32.mrf.mxu3  ;;  %1687 = vperm.xlu1 %2772, %v1657_v30   ;;  %1682 = vperm.xlu0 %2771, %v1656_v31   ;;  %v3296_v30 = vpop.permute.xlu2 %750 }
  0xb0   : > { %3963 = vst [vmem:[#allocation13_spill] sm:$0xff] %v3177_v34  ;;  %v3179_v35 = vpop.f32.mrf.mxu1 }
  0xb1   : > { %3964 = vst [vmem:[#allocation14_spill] sm:$0xff] %v3179_v35 }
  0xb2   : > { %3979 = vst [vmem:[#allocation29_spill] sm:$0xff] %v3296_v30 }
  0xb6   : > { %v3192_v40 = vpop.f32.mrf.mxu2  ;;  %2081 = vperm.xlu2 %2773, %v2067_v36   ;;  %v3194_v41 = vpop.f32.mrf.mxu0 }
  0xb7   : > { %3965 = vst [vmem:[#allocation15_spill] sm:$0xff] %v3192_v40  ;;  %v3196_v42 = vpop.f32.mrf.mxu3  ;;  %2076 = vperm.xlu1 %2772, %v2066_v37   ;;  %1677 = vperm.xlu0 %2771, %v1655_v38  }
  0xb8   : > { %3966 = vst [vmem:[#allocation16_spill] sm:$0xff] %v3196_v42  ;;  %v3198_v43 = vpop.f32.mrf.mxu1 }
  0xbe   : > { %v3213_v49 = vpop.f32.mrf.mxu2  ;;  %2156 = vperm.xlu2 %2773, %v2146_v46   ;;  %v3215_v50 = vpop.f32.mrf.mxu0 }
  0xbf   : > { %3967 = vst [vmem:[#allocation17_spill] sm:$0xff] %v3213_v49  ;;  %v3219_v52 = vpop.f32.mrf.mxu3  ;;  %2091 = vperm.xlu1 %2772, %v2069_v47   ;;  %2086 = vperm.xlu0 %2771, %v2068_v48   ;;  %v3306_v46 = vpop.permute.xlu1 %765 }
  0xc0   : > { %3968 = vst [vmem:[#allocation18_spill] sm:$0xff] %v3219_v52  ;;  %v3221_v53 = vpop.f32.mrf.mxu1  ;;  %v3308_v47 = vpop.permute.xlu0 %760 }
  0xc1   : > { %3982 = vst [vmem:[#allocation32_spill] sm:$0xff] %v3306_v46 }
  0xc2   : > { %3983 = vst [vmem:[#allocation33_spill] sm:$0xff] %v3308_v47 }
  0xc6   : > { %v3236_v59 = vpop.f32.mrf.mxu2  ;;  %2166 = vperm.xlu2 %2773, %v2148_v55   ;;  %v3238_v60 = vpop.f32.mrf.mxu0 }
  0xc7   : > { %v3240_v61 = vpop.f32.mrf.mxu3  ;;  %2096 = vperm.xlu1 %2772, %v2070_v56   ;;  %2161 = vperm.xlu0 %2771, %v2147_v57   ;;  %v3314_v56 = vpop.permute.xlu2 %487 }
  0xc8   : > { %3969 = vst [vmem:[#allocation19_spill] sm:$0xff] %v3240_v61  ;;  %v3242_v62 = vpop.f32.mrf.mxu1 }
  0xce   : > { %v3257_v5 = vpop.f32.mrf.mxu2  ;;  %2106 = vperm.xlu2 %2773, %v2072_v0   ;;  %v3259_v6 = vpop.f32.mrf.mxu0 }
  0xcf   : > { %3971 = vst [vmem:[#allocation21_spill] sm:$0xff] %v3257_v5  ;;  %v3263_v8 = vpop.f32.mrf.mxu3  ;;  %2171 = vperm.xlu1 %2772, %v2149_v1   ;;  %2101 = vperm.xlu0 %2771, %v2071_v2   ;;  %v483_v1 = vpop.permute.xlu1 %482 }
  0xd0   : > { %3973 = vst [vmem:[#allocation23_spill] sm:$0xff] %v3263_v8  ;;  %v3265_v9 = vpop.f32.mrf.mxu1  ;;  %v3320_v2 = vpop.permute.xlu0 %755 }
  0xd1   : > { %3986 = vst [vmem:[#allocation36_spill] sm:$0xff] %v3320_v2 }
  0xd6   : > { %v3278_v14 = vpop.f32.mrf.mxu2  ;;  %2181 = vperm.xlu2 %2773, %v2151_v11   ;;  %v3280_v17 = vpop.f32.mrf.mxu0 }
  0xd7   : > { %3975 = vst [vmem:[#allocation25_spill] sm:$0xff] %v3278_v14  ;;  %v3284_v19 = vpop.f32.mrf.mxu3  ;;  %2111 = vperm.xlu1 %2772, %v2073_v12   ;;  %2176 = vperm.xlu0 %2771, %v2150_v13   ;;  %v478_v4 = vpop.permute.xlu1 %477 }
  0xd8   : > { %3977 = vst [vmem:[#allocation27_spill] sm:$0xff] %v3284_v19  ;;  %v3286_v22 = vpop.f32.mrf.mxu1  ;;  %v473_v27 = vpop.permute.xlu0 %472 }
  0xde   : > { %v3298_v31 = vpop.f32.mrf.mxu2  ;;  %v3300_v36 = vpop.f32.mrf.mxu0 }
  0xdf   : > { %3980 = vst [vmem:[#allocation30_spill] sm:$0xff] %v3298_v31  ;;  %v3302_v37 = vpop.f32.mrf.mxu3  ;;  %2191 = vperm.xlu1 %2772, %v2153_v24   ;;  %2186 = vperm.xlu0 %2771, %v2152_v29   ;;  %v3328_v29 = vpop.permute.xlu2 %462 }
  0xe0   : > { %3981 = vst [vmem:[#allocation31_spill] sm:$0xff] %v3302_v37  ;;  %v3304_v38 = vpop.f32.mrf.mxu1  ;;  %v468_v47 = vpop.permute.xlu0 %467 }
  0xe1   : > { %v453_v52 = vpop.permute.xlu1 %452 }
  0xe6   : > { %v3310_v48 = vpop.f32.mrf.mxu2  ;;  %v3312_v55 = vpop.f32.mrf.mxu0 }
  0xe7   : > { %3984 = vst [vmem:[#allocation34_spill] sm:$0xff] %v3310_v48  ;;  %v3316_v57 = vpop.f32.mrf.mxu3  ;;  %v3336_v34 = vpop.permute.xlu2 %457 }
  0xe8   : > { %3985 = vst [vmem:[#allocation35_spill] sm:$0xff] %v3316_v57  ;;  %v3318_v0 = vpop.f32.mrf.mxu1  ;;  %v443_v20 = vpop.permute.xlu0 %442 }
  0xe9   : > { %v448_v8 = vpop.permute.xlu1 %447 }
  0xee   : > { %v3322_v11 = vpop.f32.mrf.mxu2  ;;  %v596_v12 = vpop.f32.mrf.mxu0 }
  0xef   : > { %v3324_v13 = vpop.f32.mrf.mxu3  ;;  %v433_v61 = vpop.permute.xlu2 %432 }
  0xf0   : > { %3987 = vst [vmem:[#allocation37_spill] sm:$0xff] %v3324_v13  ;;  %v3326_v24 = vpop.f32.mrf.mxu1  ;;  %v3355_v31 = vadd.f32 %v3215_v50, %v433_v61  ;;  %v3358_v23 = vadd.f32 %v3221_v53, %v433_v61 }
  0xf2   : > { %3990 = vst [vmem:[#allocation40_spill] sm:$0xff] %v3355_v31 }
  0xf3   : > { %3991 = vst [vmem:[#allocation41_spill] sm:$0xff] %v3358_v23 }
  0xf6   : > { %v3330_v16 = vpop.f32.mrf.mxu2  ;;  %v598_v15 = vpop.f32.mrf.mxu0 }
  0xf7   : > { %v3332_v25 = vpop.f32.mrf.mxu3  ;;  %v428_v5 = vpop.permute.xlu2 %427 }
  0xf8   : > { %v3334_v30 = vpop.f32.mrf.mxu1  ;;  %v3349_v14 = vadd.f32 %v3194_v41, %v428_v5  ;;  %v3352_v63 = vadd.f32 %v3198_v43, %v428_v5  ;;  %v3366_v41 = vadd.f32 %v3236_v59, %v3282_v18  ;;  %v438_v43 = vpop.permute.xlu0 %437  ;;  %v3381_v59 = vadd.f32 %v3259_v6, %v443_v20 }
  0xf9   : > { %v3368_v5 = vpop.permute.xlu1 %422  ;;  %v3371_v13 = vadd.f32 %v3238_v60, %v438_v43  ;;  %v3374_v53 = vadd.f32 %v3242_v62, %v438_v43  ;;  %v3385_v60 = vadd.f32 %v3265_v9, %v443_v20  ;;  %v3388_v62 = vadd.f32 %v3280_v17, %v448_v8 }
  0xfa   : > { %3988 = vst [vmem:[#allocation38_spill] sm:$0xff] %v3349_v14  ;;  %v3378_v61 = vadd.f32 %v3175_v33, %v3368_v5  ;;  %v3391_v33 = vadd.f32 %v3300_v36, %v453_v52  ;;  %v599_v20 = vadd.f32 %v598_v15, %v468_v47 }
  0xfb   : > { %3989 = vst [vmem:[#allocation39_spill] sm:$0xff] %v3352_v63 }
  0xfc   : > { %3992 = vst [vmem:[#allocation42_spill] sm:$0xff] %v3366_v41  ;;  %v676_v36 = vmax.f32 %v3391_v33, 0.0 }
  0xfe   : > { %v3338_v32 = vpop.f32.mrf.mxu2  ;;  %v601_v2 = vpop.f32.mrf.mxu0 }
  0xff   : > { %v3340_v42 = vpop.f32.mrf.mxu3  ;;  %v602_v35 = vadd.f32 %v601_v2, %v473_v27 }
 0x100   : > { %v650_v40 = vpop.f32.mrf.mxu1 }
 0x101   : > { %v651_v2 = vadd.f32 %v650_v40, %v473_v27  ;;  %v684_v9 = vmax.f32 %v602_v35, 0.0  ;;  %v3400_v27 = vadd.f32 %v3304_v38, %v453_v52  ;;  %v594_v35 = vadd.f32 %v3312_v55, %v3336_v34 }
 0x103   : > { %v685_v40 = vmax.f32 %v651_v2, 0.0 }
 0x106   : > { %v3342_v49 = vpop.f32.mrf.mxu2  ;;  %v603_v46 = vpop.f32.mrf.mxu0 }
 0x107   : > { %v3344_v21 = vpop.f32.mrf.mxu3  ;;  %v604_v48 = vadd.f32 %v603_v46, %v478_v4 }
 0x108   : > { %v652_v28 = vpop.f32.mrf.mxu1 }
 0x109   : > { %v653_v14 = vadd.f32 %v652_v28, %v478_v4  ;;  %v646_v4 = vadd.f32 %v3326_v24, %v3328_v29  ;;  %v648_v28 = vadd.f32 %v3334_v30, %v468_v47  ;;  %v981_v24 = vadd.f32 %v3344_v21, %v3200_v44 }
 0x10a   : > { %v927_v21 = vadd.f32 %v3330_v16, %v3190_v39 }
 0x10e   : > { %v933_v19 = vpop.f32.mrf.mxu2  ;;  %v606_v26 = vpop.f32.mrf.mxu0 }
 0x10f   : > { %v3346_v10 = vpop.f32.mrf.mxu3  ;;  %v607_v50 = vadd.f32 %v606_v26, %v483_v1 }
 0x110   : > { %v655_v37 = vpop.f32.mrf.mxu1  ;;  %v983_v55 = vadd.f32 %v3346_v10, %v3223_v54  ;;  %v677_v10 = vmax.f32 %v3400_v27, 0.0 }
 0x111   : > { %v656_v63 = vadd.f32 %v655_v37, %v483_v1  ;;  %v688_v18 = vmax.f32 %v607_v50, 0.0  ;;  %v3395_v37 = vadd.f32 %v3286_v22, %v448_v8  ;;  %v686_v1 = vmax.f32 %v604_v48, 0.0 }
 0x112   : > { %v687_v8 = vmax.f32 %v653_v14, 0.0  ;;  %v682_v48 = vmax.f32 %v599_v20, 0.0  ;;  %v929_v50 = vadd.f32 %v3338_v32, %v3217_v51  ;;  %v1017_v33 = vmax.f32 %v983_v55, 0.0 }
 0x113   : > { %v689_v17 = vmax.f32 %v656_v63, 0.0  ;;  %v643_v63 = vadd.f32 %v3318_v0, %v3336_v34  ;;  %v704_v47 = vpack.c.bf16 %v686_v1, %v684_v9  ;;  %v932_v34 = vadd.f32 %v3342_v49, %v3200_v44 }
 0x114   : > { %v978_v49 = vadd.f32 %v3340_v42, %v3217_v51  ;;  %v672_v32 = vmax.f32 %v3381_v59, 0.0  ;;  %v1015_v20 = vmax.f32 %v981_v24, 0.0  ;;  %v924_v42 = vadd.f32 %v3322_v11, %v3255_v3  ;;  %v413_v24 = vpop.permute.xlu0 %412 }
 0x115   : > { %v1014_v44 = vmax.f32 %v932_v34, 0.0  ;;  %v1012_v51 = vmax.f32 %v929_v50, 0.0  ;;  %v673_v1 = vmax.f32 %v3385_v60, 0.0  ;;  %v3997_v60 = vld [vmem:[#allocation35_spill] sm:$0xff] }
 0x116   : > { %v936_v57 = vpop.f32.mrf.mxu2  ;;  %v608_v7 = vpop.f32.mrf.mxu0  ;;  %v1013_v59 = vmax.f32 %v978_v49, 0.0 }
 0x117   : > { %v985_v41 = vpop.f32.mrf.mxu3  ;;  %v609_v26 = vadd.f32 %v608_v7, %v3314_v56  ;;  %v597_v7 = vadd.f32 %v596_v12, %v3328_v29  ;;  %v937_v22 = vadd.f32 %v936_v57, %v3202_v45  ;;  %v705_v12 = vpack.c.bf16 %v687_v8, %v685_v40 }
 0x118   : > { %v657_v43 = vpop.f32.mrf.mxu1  ;;  %v986_v52 = vadd.f32 %v985_v41, %v3202_v45  ;;  %v1010_v40 = vmax.f32 %v927_v21, 0.0  ;;  %v670_v8 = vmax.f32 %v3371_v13, 0.0 }
 0x119   : > { %v690_v6 = vmax.f32 %v609_v26, 0.0  ;;  %v658_v46 = vadd.f32 %v657_v43, %v3314_v56  ;;  %v934_v56 = vadd.f32 %v933_v19, %v3223_v54  ;;  %v1018_v45 = vmax.f32 %v937_v22, 0.0 }
 0x11a   : > { %v678_v19 = vmax.f32 %v594_v35, 0.0  ;;  %v1019_v29 = vmax.f32 %v986_v52, 0.0  ;;  %v679_v43 = vmax.f32 %v643_v63, 0.0  ;;  %v3998_v35 = vld [vmem:[#allocation28_spill] sm:$0xff]  ;;  %v3999_v63 = vld [vmem:[#allocation30_spill] sm:$0xff]  ;;  %v1032_v52 = vpack.c.bf16 %v1012_v51, %v1010_v40  ;;  %v4013_v51 = vld [vmem:[#allocation41_spill] sm:$0xff] }
 0x11b   : > { %v691_v23 = vmax.f32 %v658_v46, 0.0  ;;  %v706_v31 = vpack.c.bf16 %v690_v6, %v688_v18  ;;  %v680_v18 = vmax.f32 %v597_v7, 0.0  ;;  %v1016_v26 = vmax.f32 %v934_v56, 0.0  ;;  %v4000_v56 = vld [vmem:[#allocation31_spill] sm:$0xff] }
 0x11c   : > { %v674_v46 = vmax.f32 %v3388_v62, 0.0  ;;  %v976_v7 = vadd.f32 %v3332_v25, %v3190_v39  ;;  %v700_v16 = vpack.c.bf16 %v678_v19, %v676_v36  ;;  %v675_v62 = vmax.f32 %v3395_v37, 0.0  ;;  %v3995_v25 = vld [vmem:[#allocation34_spill] sm:$0xff]  ;;  %v4005_v19 = vld [vmem:[#allocation9_spill] sm:$0xff] }
 0x11d   : > { %1152 = vmatpush.bf16.msrb.mxu2 %v706_v31  ;;  %v707_v15 = vpack.c.bf16 %v691_v23, %v689_v17  ;;  %v681_v31 = vmax.f32 %v646_v4, 0.0  ;;  %v683_v23 = vmax.f32 %v648_v28, 0.0  ;;  %v1034_v9 = vpack.c.bf16 %v1016_v26, %v1014_v44  ;;  %v3993_v17 = vld [vmem:[#allocation37_spill] sm:$0xff]  ;;  %v3994_v28 = vld [vmem:[#allocation22_spill] sm:$0xff] }
 0x11e   : > { %v938_v38 = vpop.f32.mrf.mxu2  ;;  %v973_v27 = vadd.f32 %v3993_v17, %v3255_v3  ;;  %v1035_v4 = vpack.c.bf16 %v1017_v33, %v1015_v20  ;;  %v922_v39 = vadd.f32 %v3995_v25, %v3994_v28  ;;  %v701_v11 = vpack.c.bf16 %v679_v43, %v677_v10  ;;  %v3996_v36 = vld [vmem:[#allocation14_spill] sm:$0xff]  ;;  %v4008_v10 = vld [vmem:[#allocation40_spill] sm:$0xff]  ;;  %v4010_v43 = vld [vmem:[#allocation23_spill] sm:$0xff] }
 0x11f   : > { %v939_v30 = vadd.f32 %v938_v38, %v3234_v58  ;;  %v987_v14 = vpop.f32.mrf.mxu3  ;;  %1181 = vmatpush.bf16.msrb.mxu3 %v707_v15  ;;  %v703_v6 = vpack.c.bf16 %v683_v23, %v681_v31  ;;  %v626_v22 = vadd.f32 %v3996_v36, %v3368_v5  ;;  %v971_v15 = vadd.f32 %v3997_v60, %v3994_v28  ;;  %v4001_v31 = vld [vmem:[#allocation20_spill] sm:$0xff]  ;;  %v4002_v23 = vld [vmem:[#allocation25_spill] sm:$0xff]  ;;  %v4021_v60 = vld [vmem:[#allocation18_spill] sm:$0xff] }
 0x120   : > { %v988_v57 = vadd.f32 %v987_v14, %v3234_v58  ;;  %v702_v58 = vpack.c.bf16 %v682_v48, %v680_v18  ;;  %v1011_v3 = vmax.f32 %v976_v7, 0.0  ;;  %v919_v37 = vadd.f32 %v3999_v63, %v3998_v35  ;;  %v4012_v7 = vld [vmem:[#allocation7_spill] sm:$0xff]  ;;  %v4016_v17 = vld [vmem:[#allocation17_spill] sm:$0xff] }
 0x121   : > { %v1020_v0 = vmax.f32 %v939_v30, 0.0  ;;  %1153 = vmatpush.bf16.msrb.mxu2 %v704_v47  ;;  %v1008_v18 = vmax.f32 %v924_v42, 0.0  ;;  %v698_v38 = vpack.c.bf16 %v674_v46, %v672_v32  ;;  %v671_v48 = vmax.f32 %v3374_v53, 0.0  ;;  %v418_v47 = vpop.permute.xlu1 %417  ;;  %v4011_v32 = vld [vmem:[#allocation11_spill] sm:$0xff] }
 0x122   : > { %v1021_v41 = vmax.f32 %v988_v57, 0.0  ;;  %v968_v13 = vadd.f32 %v4000_v56, %v3998_v35  ;;  %v1009_v30 = vmax.f32 %v973_v27, 0.0  ;;  %v1033_v14 = vpack.c.bf16 %v1013_v59, %v1011_v3  ;;  %v4017_v59 = vld [vmem:[#allocation26_spill] sm:$0xff] }
 0x123   : > { %1182 = vmatpush.bf16.msrb.mxu3 %v705_v12  ;;  %v1036_v54 = vpack.c.bf16 %v1020_v0, %v1018_v45  ;;  %v664_v5 = vmax.f32 %v3378_v61, 0.0  ;;  %v917_v55 = vadd.f32 %v4002_v23, %v4001_v31  ;;  %v1006_v57 = vmax.f32 %v922_v39, 0.0  ;;  %v4003_v45 = vld [vmem:[#allocation24_spill] sm:$0xff]  ;;  %v4004_v0 = vld [vmem:[#allocation21_spill] sm:$0xff]  ;;  %v4007_v61 = vld [vmem:[#allocation6_spill] sm:$0xff] }
 0x124   : > { %v1037_v2 = vpack.c.bf16 %v1021_v41, %v1019_v29  ;;  %v699_v34 = vpack.c.bf16 %v675_v62, %v673_v1  ;;  %v914_v12 = vadd.f32 %v4004_v0, %v4003_v45  ;;  %v574_v53 = vadd.f32 %v4005_v19, %v418_v47  ;;  %v4006_v29 = vld [vmem:[#allocation27_spill] sm:$0xff]  ;;  %v4015_v1 = vld [vmem:[#allocation32_spill] sm:$0xff]  ;;  %v4022_v3 = vld [vmem:[#allocation42_spill] sm:$0xff] }
 0x125   : > { %1070 = vmatpush.bf16.msrb.mxu0 %v1036_v54  ;;  %1154 = vmatpush.bf16.msrb.mxu2 %v702_v58  ;;  %v966_v41 = vadd.f32 %v4006_v29, %v4001_v31  ;;  %v1007_v50 = vmax.f32 %v971_v15, 0.0  ;;  %v572_v26 = vadd.f32 %v4007_v61, %v413_v24  ;;  %v1004_v54 = vmax.f32 %v919_v37, 0.0  ;;  %v4027_v31 = vld [vmem:[#allocation16_spill] sm:$0xff]  ;;  %v4031_v61 = vld [vmem:[#allocation29_spill] sm:$0xff] }
 0x126   : > { %1099 = vmatpush.bf16.msrb.mxu1 %v1037_v2  ;;  %v1030_v58 = vpack.c.bf16 %v1008_v18, %v1006_v57  ;;  %v4009_v49 = vmax.f32 %v4008_v10, 0.0  ;;  %v665_v2 = vmax.f32 %v626_v22, 0.0  ;;  %v963_v21 = vadd.f32 %v4010_v43, %v4003_v45  ;;  %v4023_v18 = vld [vmem:[#allocation33_spill] sm:$0xff]  ;;  %v4028_v57 = vld [vmem:[#allocation36_spill] sm:$0xff] }
 0x127   : > { %1183 = vmatpush.bf16.msrb.mxu3 %v703_v6  ;;  %v1005_v44 = vmax.f32 %v968_v13, 0.0  ;;  %v1031_v6 = vpack.c.bf16 %v1009_v30, %v1007_v50  ;;  %v623_v46 = vadd.f32 %v4011_v32, %v418_v47  ;;  %v621_v20 = vadd.f32 %v4012_v7, %v413_v24  ;;  %v4025_v13 = vld [vmem:[#allocation39_spill] sm:$0xff]  ;;  %v2706_v47 = vld [vmem:[%s3929_s3 + $0xc] sm:$0xf0]  ;;  %v2718_v7 = vld [vmem:[%s3929_s3 + $0x10] sm:$0xf0] }
 0x128   : > { %v696_v33 = vpack.c.bf16 %v670_v8, %v4009_v49  ;;  %v1002_v42 = vmax.f32 %v917_v55, 0.0  ;;  %v909_v27 = vadd.f32 %v4016_v17, %v4015_v1  ;;  %v1000_v28 = vmax.f32 %v914_v12, 0.0  ;;  %v4019_v8 = vld [vmem:[#allocation38_spill] sm:$0xff] }
 0x129   : > { %1071 = vmatpush.bf16.msrb.mxu0 %v1034_v9  ;;  %1155 = vmatpush.bf16.msrb.mxu2 %v700_v16  ;;  %v4014_v9 = vmax.f32 %v4013_v51, 0.0  ;;  %v1003_v25 = vmax.f32 %v966_v41, 0.0  ;;  %v662_v39 = vmax.f32 %v574_v53, 0.0  ;;  %v660_v40 = vmax.f32 %v572_v26, 0.0  ;;  %v4030_v53 = vld [vmem:[#allocation13_spill] sm:$0xff]  ;;  %v4032_v26 = vld [vmem:[#allocation8_spill] sm:$0xff] }
 0x12a   : > { %1100 = vmatpush.bf16.msrb.mxu1 %v1035_v4  ;;  %v4018_v4 = vld [vmem:[#allocation19_spill] sm:$0xff]  ;;  %v4020_v36 = vmax.f32 %v4019_v8, 0.0  ;;  %v958_v15 = vadd.f32 %v4021_v60, %v4015_v1  ;;  %v998_v35 = vmax.f32 %v4022_v3, 0.0  ;;  %v1001_v63 = vmax.f32 %v963_v21, 0.0  ;;  %v4033_v49 = vld [vmem:[#allocation10_spill] sm:$0xff]  ;;  %v4035_v1 = vld [vmem:[#allocation5_spill] sm:$0xff] }
 0x12b   : > { %1184 = vmatpush.bf16.msrb.mxu3 %v701_v11  ;;  %v697_v16 = vpack.c.bf16 %v671_v48, %v4014_v9  ;;  %v961_v62 = vadd.f32 %v4018_v4, %v4017_v59  ;;  %v1028_v11 = vpack.c.bf16 %v1004_v54, %v1002_v42  ;;  %v1029_v37 = vpack.c.bf16 %v1005_v44, %v1003_v25  ;;  %v2554_v17 = vld [vmem:[%s3929_s3 + $0x20] sm:$0xf]  ;;  %v2538_v4 = vld [vmem:[%s3929_s3 + $0x24] sm:$0xf]  ;;  %v2720_v8 = vld [vmem:[%s3929_s3 + $0x50] sm:$0xf0] }
 0x12c   : > { %v694_v22 = vpack.c.bf16 %v4020_v36, %v664_v5  ;;  %v663_v48 = vmax.f32 %v623_v46, 0.0  ;;  %v661_v56 = vmax.f32 %v621_v20, 0.0  ;;  %v4026_v30 = vmax.f32 %v4025_v13, 0.0  ;;  %v2550_v5 = vld [vmem:[%s3929_s3] sm:$0xf] }
 0x12d   : > { %1072 = vmatpush.bf16.msrb.mxu0 %v1032_v52  ;;  %1156 = vmatpush.bf16.msrb.mxu2 %v698_v38  ;;  %v4024_v52 = vld [vmem:[#allocation15_spill] sm:$0xff]  ;;  %v956_v23 = vadd.f32 %v4027_v31, %v4023_v18  ;;  %v999_v55 = vmax.f32 %v961_v62, 0.0  ;;  %v996_v0 = vmax.f32 %v909_v27, 0.0  ;;  %v1026_v12 = vpack.c.bf16 %v1000_v28, %v998_v35  ;;  %v2534_v46 = vld [vmem:[%s3929_s3 + $0x4] sm:$0xf] }
 0x12e   : > { %1101 = vmatpush.bf16.msrb.mxu1 %v1033_v14  ;;  %v907_v38 = vadd.f32 %v4024_v52, %v4023_v18  ;;  %v695_v14 = vpack.c.bf16 %v4026_v30, %v665_v2  ;;  %v692_v19 = vpack.c.bf16 %v662_v39, %v660_v40  ;;  %v953_v24 = vadd.f32 %v4030_v53, %v4028_v57  ;;  %v2707_v27 = vld [vmem:[%s3929_s3 + $0x2c] sm:$0xf0]  ;;  %v2719_v62 = vld [vmem:[%s3929_s3 + $0x30] sm:$0xf0]  ;;  %v2558_v25 = vld [vmem:[%s3929_s3 + $0x40] sm:$0xf] }
 0x12f   : > { %1185 = vmatpush.bf16.msrb.mxu3 %v699_v34  ;;  %v4029_v34 = vld [vmem:[#allocation12_spill] sm:$0xff]  ;;  %v997_v29 = vmax.f32 %v958_v15, 0.0  ;;  %v1027_v41 = vpack.c.bf16 %v1001_v63, %v999_v55  ;;  %v2551_v50 = vor.u32 %v2706_v47, %v2550_v5  ;;  %v902_v54 = vadd.f32 %v4032_v26, %v4031_v61  ;;  %v2546_v3 = vld [vmem:[%s3929_s3 + $0x64] sm:$0xf]  ;;  %v2723_v18 = vld [vmem:[%s3927_s1 + $0x88] sm:$0xff] }
 0x130   : > { %v904_v45 = vadd.f32 %v4029_v34, %v4028_v57  ;;  %v693_v10 = vpack.c.bf16 %v663_v48, %v661_v56  ;;  %v995_v2 = vmax.f32 %v956_v23, 0.0  ;;  %v993_v44 = vmax.f32 %v953_v24, 0.0  ;;  %v2708_v39 = vld [vmem:[%s3929_s3 + $0x4c] sm:$0xf0]  ;;  %v2721_v35 = vld [vmem:[%s3929_s3 + $0x70] sm:$0xf0] }
 0x131   : > { %1073 = vmatpush.bf16.msrb.mxu0 %v1030_v58  ;;  %1157 = vmatpush.bf16.msrb.mxu2 %v696_v33  ;;  %v994_v58 = vmax.f32 %v907_v38, 0.0  ;;  %v951_v33 = vadd.f32 %v4033_v49, %v4031_v61  ;;  %v990_v32 = vmax.f32 %v902_v54, 0.0  ;;  %v2535_v9 = vor.u32 %v2718_v7, %v2534_v46  ;;  %v2709_v60 = vld [vmem:[%s3929_s3 + $0x6c] sm:$0xf0]  ;;  %v2725_v38 = vld [vmem:[%s3927_s1 + $0x98] sm:$0xff]  ;;  %v2726_v56 = vld [vmem:[%s3927_s1 + $0xa0] sm:$0xff]  ;;  %v3595_v54 = vpop.permute.xlu1 %1304 }
 0x132   : > { %1102 = vmatpush.bf16.msrb.mxu1 %v1031_v6  ;;  %v992_v43 = vmax.f32 %v904_v45, 0.0  ;;  %v1025_v6 = vpack.c.bf16 %v997_v29, %v995_v2  ;;  %v2555_v59 = vor.u32 %v2707_v27, %v2554_v17  ;;  %v2539_v28 = vor.u32 %v2719_v62, %v2538_v4  ;;  %v2724_v52 = vld [vmem:[%s3927_s1 + $0x90] sm:$0xff]  ;;  %v2727_v45 = vld [vmem:[%s3927_s1 + $0xa8] sm:$0xff]  ;;  %v3585_v29 = vpop.permute.xlu2 %1314  ;;  %v2729_v17 = vld [vmem:[%s3927_s1 + $0xb8] sm:$0xff] }
 0x133   : > { %1186 = vmatpush.bf16.msrb.mxu3 %v697_v16  ;;  %v1024_v21 = vpack.c.bf16 %v996_v0, %v994_v58  ;;  %v991_v20 = vmax.f32 %v951_v33, 0.0  ;;  %v4034_v16 = vld [vmem:[#allocation4_spill] sm:$0xff]  ;;  %v2559_v40 = vor.u32 %v2708_v39, %v2558_v25  ;;  %v2547_v63 = vor.u32 %v2721_v35, %v2546_v3 }
 0x134   : > { %v1022_v42 = vpack.c.bf16 %v992_v43, %v990_v32  ;;  %v2728_v49 = vld [vmem:[%s3927_s1 + $0xb0] sm:$0xff] }
 0x135   : > { %1074 = vmatpush.bf16.msrb.mxu0 %v1028_v11  ;;  %1158 = vmatpush.bf16.msrb.mxu2 %v694_v22  ;;  %v1023_v51 = vpack.c.bf16 %v993_v44, %v991_v20  ;;  %v2542_v11 = vld [vmem:[%s3929_s3 + $0x44] sm:$0xf]  ;;  %v2562_v22 = vld [vmem:[%s3929_s3 + $0x60] sm:$0xf] }
 0x136   : > { %1103 = vmatpush.bf16.msrb.mxu1 %v1029_v37  ;;  %v2543_v36 = vor.u32 %v2720_v8, %v2542_v11  ;;  %v2563_v15 = vor.u32 %v2709_v60, %v2562_v22  ;;  %v2722_v37 = vld [vmem:[%s3927_s1 + $0x80] sm:$0xff] }
 0x137   : > { %1187 = vmatpush.bf16.msrb.mxu3 %v695_v14 }
 0x139   : > { %1075 = vmatpush.bf16.msrb.mxu0 %v1026_v12  ;;  %1159 = vmatpush.bf16.msrb.mxu2 %v692_v19  ;;  %v3610_v32 = vpop.permute.xlu1 %1299 }
 0x13a   : > { %1104 = vmatpush.bf16.msrb.mxu1 %v1027_v41 }
 0x13b   : > { %1188 = vmatpush.bf16.msrb.mxu3 %v693_v10  ;;  %v3597_v10 = vpop.permute.xlu2 %1309 }
 0x13c   : > { %1160 = vmatmul.bf16.vlgmr.msrb.gmra.mxu2 %v2551_v50 }
 0x13d   : > { %1076 = vmatpush.bf16.msrb.mxu0 %v1024_v21 }
 0x13e   : > { %1105 = vmatpush.bf16.msrb.mxu1 %v1025_v6  ;;  %1189 = vmatmul.bf16.vlgmr.msrb.gmra.mxu3 %v2551_v50 }
 0x141   : > { %1077 = vmatpush.bf16.msrb.mxu0 %v1022_v42 }
 0x142   : > { %1106 = vmatpush.bf16.msrb.mxu1 %v1023_v51  ;;  %v3620_v51 = vpop.permute.xlu0 %1319 }
 0x143   : > { %v3618_v42 = vpop.permute.xlu2 %1284 }
 0x144   : > { %1078 = vmatmul.bf16.vlgmr.msrb.gmra.mxu0 %v2535_v9 }
 0x145   : > { %1393 = vmatpush.bf16.msra.mxu0 %v4034_v16  ;;  %1107 = vmatmul.bf16.vlgmr.msrb.gmra.mxu1 %v2535_v9 }
 0x146   : > { %1442 = vmatpush.bf16.msra.mxu1 %v4035_v1 }
 0x14a   : > { %v3635_v8 = vpop.permute.xlu0 %1294 }
 0x14b   : > { %v1280_v39 = vpop.permute.xlu2 %1279 }
 0x14c   : > { %1165 = vmatmul.bf16.gmra.mxu2 %v2555_v59 }
 0x14e   : > { %1194 = vmatmul.bf16.gmra.mxu3 %v2555_v59 }
 0x152   : > { %v3637_v3 = vpop.permute.xlu0 %1289 }
 0x153   : > { %v1255_v22 = vpop.permute.xlu2 %1254 }
 0x154   : > { %1083 = vmatmul.bf16.gmra.mxu0 %v2539_v28 }
 0x155   : > { %1112 = vmatmul.bf16.gmra.mxu1 %v2539_v28  ;;  %v1275_v28 = vpop.permute.xlu1 %1274 }
 0x15c   : > { %1170 = vmatmul.bf16.gmra.mxu2 %v2559_v40 }
 0x15e   : > { %1199 = vmatmul.bf16.gmra.mxu3 %v2559_v40 }
 0x164   : > { %1088 = vmatmul.bf16.gmra.mxu0 %v2543_v36 }
 0x165   : > { %1117 = vmatmul.bf16.gmra.mxu1 %v2543_v36  ;;  %v1270_v36 = vpop.permute.xlu1 %1269 }
 0x16c   : > { %1175 = vmatmul.bf16.gmra.mxu2 %v2563_v15 }
 0x16d   : > { %v1245_v35 = vpop.permute.xlu1 %1244 }
 0x16e   : > { %1204 = vmatmul.bf16.gmra.mxu3 %v2563_v15 }
 0x174   : > { %1093 = vmatmul.bf16.gmra.mxu0 %v2547_v63 }
 0x175   : > { %1122 = vmatmul.bf16.gmra.mxu1 %v2547_v63 }
 0x184   : > { %2596 = vmatmul.msk.bf16.vlgmr.msra.gmra.mxu0 %vm530_vm1, %v2722_v37 }
 0x185   : > { %2604 = vmatmul.msk.bf16.vlgmr.msra.gmra.mxu1 %vm530_vm1, %v2722_v37  ;;  %v1250_v37 = vpop.permute.xlu2 %1249 }
 0x194   : > { %2597 = vmatmul.msk.bf16.gmra.mxu0 %vm530_vm1, %v2723_v18 }
 0x195   : > { %2605 = vmatmul.msk.bf16.gmra.mxu1 %vm530_vm1, %v2723_v18 }
 0x1a4   : > { %2598 = vmatmul.msk.bf16.gmra.mxu0 %vm530_vm1, %v2724_v52 }
 0x1a5   : > { %2606 = vmatmul.msk.bf16.gmra.mxu1 %vm530_vm1, %v2724_v52 }
 0x1b4   : > { %2599 = vmatmul.msk.bf16.gmra.mxu0 %vm530_vm1, %v2725_v38 }
 0x1b5   : > { %2607 = vmatmul.msk.bf16.gmra.mxu1 %vm530_vm1, %v2725_v38 }
 0x1bf   : > { %v1161_v48 = vpop.f32.mrf.mxu2 }
 0x1c1   : > { %v1079_v13 = vpop.f32.mrf.mxu0  ;;  %v1190_v30 = vpop.f32.mrf.mxu3 }
 0x1c2   : > { %v1108_v14 = vpop.f32.mrf.mxu1  ;;  %v3562_v5 = vadd.f32 %v1161_v48, %v1079_v13 }
 0x1c3   : > { %v3564_v47 = vadd.f32 %v1190_v30, %v1108_v14 }
 0x1c4   : > { %2600 = vmatmul.msk.bf16.gmra.mxu0 %vm530_vm1, %v2726_v56 }
 0x1c5   : > { %2608 = vmatmul.msk.bf16.gmra.mxu1 %vm530_vm1, %v2726_v56 }
 0x1c7   : > { %v3568_v31 = vpop.f32.mrf.mxu2 }
 0x1c9   : > { %v3570_v23 = vpop.f32.mrf.mxu0  ;;  %v3572_v55 = vpop.f32.mrf.mxu3 }
 0x1ca   : > { %v3574_v57 = vpop.f32.mrf.mxu1 }
 0x1cf   : > { %v1166_v34 = vpop.f32.mrf.mxu2 }
 0x1d1   : > { %v1084_v0 = vpop.f32.mrf.mxu0  ;;  %v1195_v12 = vpop.f32.mrf.mxu3 }
 0x1d2   : > { %v1113_v19 = vpop.f32.mrf.mxu1  ;;  %v3579_v53 = vadd.f32 %v1166_v34, %v1084_v0  ;;  %v1265_v0 = vpop.permute.xlu0 %1264 }
 0x1d3   : > { %v3581_v24 = vadd.f32 %v1195_v12, %v1113_v19 }
 0x1d4   : > { %2601 = vmatmul.msk.bf16.gmra.mxu0 %vm530_vm1, %v2727_v45 }
 0x1d5   : > { %2609 = vmatmul.msk.bf16.gmra.mxu1 %vm530_vm1, %v2727_v45 }
 0x1d7   : > { %v3587_v41 = vpop.f32.mrf.mxu2 }
 0x1d9   : > { %v3589_v50 = vpop.f32.mrf.mxu0  ;;  %v3591_v61 = vpop.f32.mrf.mxu3 }
 0x1da   : > { %v3593_v26 = vpop.f32.mrf.mxu1 }
 0x1df   : > { %v1171_v58 = vpop.f32.mrf.mxu2 }
 0x1e1   : > { %v1089_v33 = vpop.f32.mrf.mxu0  ;;  %v1200_v2 = vpop.f32.mrf.mxu3 }
 0x1e2   : > { %v1118_v43 = vpop.f32.mrf.mxu1  ;;  %v3602_v21 = vadd.f32 %v1171_v58, %v1089_v33  ;;  %v1260_v33 = vpop.permute.xlu0 %1259 }
 0x1e3   : > { %v3604_v44 = vadd.f32 %v1200_v2, %v1118_v43 }
 0x1e4   : > { %2602 = vmatmul.msk.bf16.gmra.mxu0 %vm530_vm1, %v2728_v49 }
 0x1e5   : > { %2610 = vmatmul.msk.bf16.gmra.mxu1 %vm530_vm1, %v2728_v49 }
 0x1e7   : > { %v3608_v6 = vpop.f32.mrf.mxu2 }
 0x1e8   : > { %4036 = vst [vmem:[#allocation37_spill] sm:$0xff] %v3608_v6 }
 0x1e9   : > { %v3612_v46 = vpop.f32.mrf.mxu0  ;;  %v3614_v7 = vpop.f32.mrf.mxu3 }
 0x1ea   : > { %4037 = vst [vmem:[#allocation22_spill] sm:$0xff] %v3614_v7  ;;  %v3616_v20 = vpop.f32.mrf.mxu1 }
 0x1eb   : > { %4038 = vst [vmem:[#allocation34_spill] sm:$0xff] %v3616_v20 }
 0x1ef   : > { %v1176_v9 = vpop.f32.mrf.mxu2 }
 0x1f1   : > { %v1094_v27 = vpop.f32.mrf.mxu0  ;;  %v1205_v59 = vpop.f32.mrf.mxu3 }
 0x1f2   : > { %v1123_v4 = vpop.f32.mrf.mxu1  ;;  %v3625_v62 = vadd.f32 %v1176_v9, %v1094_v27 }
 0x1f3   : > { %v3627_v25 = vadd.f32 %v1205_v59, %v1123_v4 }
 0x1f4   : > { %2603 = vmatmul.msk.bf16.gmra.mxu0 %vm530_vm1, %v2729_v17 }
 0x1f5   : > { %2611 = vmatmul.msk.bf16.gmra.mxu1 %vm530_vm1, %v2729_v17 }
 0x1f9   : > { %v3631_v40 = vpop.f32.mrf.mxu0 }
 0x1fa   : > { %4039 = vst [vmem:[#allocation14_spill] sm:$0xff] %v3631_v40  ;;  %v3633_v11 = vpop.f32.mrf.mxu1 }
 0x1fb   : > { %4040 = vst [vmem:[#allocation35_spill] sm:$0xff] %v3633_v11 }
 0x201   : > { %v1395_v60 = vpop.f32.mrf.mxu0 }
 0x202   : > { %v1444_v15 = vpop.f32.mrf.mxu1  ;;  %v1396_v63 = vadd.f32 %v1395_v60, %v1245_v35 }
 0x203   : > { %v1445_v18 = vadd.f32 %v1444_v15, %v1245_v35 }
 0x204   : > { %v1484_v13 = vmax.f32 %v1396_v63, 0.0 }
 0x205   : > { %v1485_v14 = vmax.f32 %v1445_v18, 0.0 }
 0x209   : > { %v1397_v52 = vpop.f32.mrf.mxu0 }
 0x20a   : > { %v1398_v38 = vadd.f32 %v1397_v52, %v1250_v37  ;;  %v1446_v48 = vpop.f32.mrf.mxu1 }
 0x20b   : > { %v1447_v56 = vadd.f32 %v1446_v48, %v1250_v37 }
 0x20c   : > { %v1486_v30 = vmax.f32 %v1398_v38, 0.0 }
 0x20d   : > { %v1487_v34 = vmax.f32 %v1447_v56, 0.0 }
 0x20e   : > { %v3639_v45 = vpack.c.bf16 %v1486_v30, %v1484_v13 }
 0x20f   : > { %v3641_v12 = vpack.c.bf16 %v1487_v34, %v1485_v14 }
 0x211   : > { %v1400_v19 = vpop.f32.mrf.mxu0 }
 0x212   : > { %v1449_v58 = vpop.f32.mrf.mxu1  ;;  %v1401_v49 = vadd.f32 %v1400_v19, %v1255_v22 }
 0x213   : > { %v1450_v2 = vadd.f32 %v1449_v58, %v1255_v22 }
 0x214   : > { %v1488_v59 = vmax.f32 %v1401_v49, 0.0 }
 0x215   : > { %v1489_v60 = vmax.f32 %v1450_v2, 0.0 }
 0x219   : > { %v1402_v43 = vpop.f32.mrf.mxu0 }
 0x21a   : > { %v1403_v9 = vadd.f32 %v1402_v43, %v1260_v33  ;;  %v1451_v17 = vpop.f32.mrf.mxu1 }
 0x21b   : > { %v1452_v27 = vadd.f32 %v1451_v17, %v1260_v33 }
 0x21c   : > { %v1490_v4 = vmax.f32 %v1403_v9, 0.0 }
 0x21d   : > { %v1491_v15 = vmax.f32 %v1452_v27, 0.0 }
 0x21e   : > { %v3643_v35 = vpack.c.bf16 %v1490_v4, %v1488_v59 }
 0x21f   : > { %v3645_v63 = vpack.c.bf16 %v1491_v15, %v1489_v60 }
 0x221   : > { %v1405_v37 = vpop.f32.mrf.mxu0 }
 0x222   : > { %v1454_v18 = vpop.f32.mrf.mxu1  ;;  %v1406_v52 = vadd.f32 %v1405_v37, %v1265_v0 }
 0x223   : > { %v1455_v38 = vadd.f32 %v1454_v18, %v1265_v0 }
 0x224   : > { %v1492_v30 = vmax.f32 %v1406_v52, 0.0 }
 0x225   : > { %v1493_v34 = vmax.f32 %v1455_v38, 0.0 }
 0x229   : > { %v1407_v48 = vpop.f32.mrf.mxu0 }
 0x22a   : > { %v1408_v56 = vadd.f32 %v1407_v48, %v1270_v36  ;;  %v1456_v13 = vpop.f32.mrf.mxu1 }
 0x22b   : > { %v1457_v22 = vadd.f32 %v1456_v13, %v1270_v36 }
 0x22c   : > { %v1494_v14 = vmax.f32 %v1408_v56, 0.0 }
 0x22d   : > { %v1495_v19 = vmax.f32 %v1457_v22, 0.0 }
 0x22e   : > { %v3647_v58 = vpack.c.bf16 %v1494_v14, %v1492_v30 }
 0x22f   : > { %v3649_v49 = vpack.c.bf16 %v1495_v19, %v1493_v34 }
 0x231   : > { %v1410_v33 = vpop.f32.mrf.mxu0 }
 0x232   : > { %v1459_v2 = vpop.f32.mrf.mxu1  ;;  %v1411_v43 = vadd.f32 %v1410_v33, %v1275_v28 }
 0x233   : > { %v1460_v9 = vadd.f32 %v1459_v2, %v1275_v28 }
 0x234   : > { %v1496_v4 = vmax.f32 %v1411_v43, 0.0 }
 0x235   : > { %v1497_v15 = vmax.f32 %v1460_v9, 0.0 }
 0x239   : > { %v1412_v17 = vpop.f32.mrf.mxu0 }
 0x23a   : > { %v1413_v27 = vadd.f32 %v1412_v17, %v1280_v39  ;;  %v1461_v59 = vpop.f32.mrf.mxu1 }
 0x23b   : > { %v1462_v0 = vadd.f32 %v1461_v59, %v1280_v39 }
 0x23c   : > { %v1498_v60 = vmax.f32 %v1413_v27, 0.0 }
 0x23d   : > { %v1499_v36 = vmax.f32 %v1462_v0, 0.0 }
 0x23e   : > { %v3651_v37 = vpack.c.bf16 %v1498_v60, %v1496_v4 }
 0x23f   : > { %v3653_v18 = vpack.c.bf16 %v1499_v36, %v1497_v15 }
 0x241   : > { %v1415_v52 = vpop.f32.mrf.mxu0 }
 0x242   : > { %v1464_v38 = vpop.f32.mrf.mxu1 }
 0x249   : > { %v1417_v48 = vpop.f32.mrf.mxu0 }
 0x24a   : > { %v1466_v56 = vpop.f32.mrf.mxu1 }
 0x251   : > { %v1420_v13 = vpop.f32.mrf.mxu0 }
 0x252   : > { %v1469_v22 = vpop.f32.mrf.mxu1 }
 0x259   : > { %v1422_v30 = vpop.f32.mrf.mxu0 }
 0x25a   : > { %v1471_v28 = vpop.f32.mrf.mxu1 }
 0x261   : > { %v1425_v14 = vpop.f32.mrf.mxu0 }
 0x262   : > { %v1474_v34 = vpop.f32.mrf.mxu1  ;;  %v1426_v15 = vadd.f32 %v1425_v14, %v3595_v54 }
 0x263   : > { %v1475_v40 = vadd.f32 %v1474_v34, %v3595_v54  ;;  %v1418_v54 = vadd.f32 %v1417_v48, %v3637_v3 }
 0x265   : > { %v1509_v14 = vmax.f32 %v1475_v40, 0.0 }
 0x269   : > { %v1427_v19 = vpop.f32.mrf.mxu0 }
 0x26a   : > { %v1476_v39 = vpop.f32.mrf.mxu1  ;;  %v1428_v27 = vadd.f32 %v1427_v19, %v3597_v10  ;;  %v1472_v19 = vadd.f32 %v1471_v28, %v3610_v32 }
 0x26b   : > { %v1477_v4 = vadd.f32 %v1476_v39, %v3597_v10  ;;  %v1421_v10 = vadd.f32 %v1420_v13, %v3635_v8  ;;  %v1508_v39 = vmax.f32 %v1426_v15, 0.0  ;;  %v2738_v15 = vld [vmem:[%s3927_s1 + $0xe0] sm:$0xff] }
 0x26d   : > { %v1504_v28 = vmax.f32 %v1421_v10, 0.0  ;;  %v2739_v10 = vld [vmem:[%s3927_s1 + $0xe8] sm:$0xff] }
 0x271   : > { %v1430_v33 = vpop.f32.mrf.mxu0 }
 0x272   : > { %v1479_v2 = vpop.f32.mrf.mxu1  ;;  %v1431_v43 = vadd.f32 %v1430_v33, %v3585_v29 }
 0x273   : > { %v1480_v9 = vadd.f32 %v1479_v2, %v3585_v29  ;;  %v1423_v29 = vadd.f32 %v1422_v30, %v3610_v32  ;;  %v1510_v2 = vmax.f32 %v1428_v27, 0.0  ;;  %v1467_v30 = vadd.f32 %v1466_v56, %v3637_v3  ;;  %v2735_v56 = vld [vmem:[%s3927_s1 + $0xc8] sm:$0xff] }
 0x274   : > { %v1512_v36 = vmax.f32 %v1431_v43, 0.0  ;;  %v1416_v32 = vadd.f32 %v1415_v52, %v3618_v42  ;;  %v2730_v52 = vld [vmem:[%s3929_s3 + $0x14] sm:$0xf0] }
 0x275   : > { %v1513_v7 = vmax.f32 %v1480_v9, 0.0  ;;  %v1506_v34 = vmax.f32 %v1423_v29, 0.0  ;;  %v1528_v43 = vpack.c.bf16 %v1510_v2, %v1508_v39  ;;  %v1507_v9 = vmax.f32 %v1472_v19, 0.0 }
 0x276   : > { %v1503_v40 = vmax.f32 %v1467_v30, 0.0  ;;  %v3765_v30 = vpop.permute.xlu2 %1732 }
 0x279   : > { %v1432_v17 = vpop.f32.mrf.mxu0 }
 0x27a   : > { %v1433_v59 = vadd.f32 %v1432_v17, %v3620_v51  ;;  %v1481_v0 = vpop.f32.mrf.mxu1  ;;  %v1511_v17 = vmax.f32 %v1477_v4, 0.0  ;;  %v3725_v4 = vpop.f32.mrf.mxu2 }
 0x27b   : > { %v1482_v60 = vadd.f32 %v1481_v0, %v3620_v51  ;;  %v1470_v51 = vadd.f32 %v1469_v22, %v3635_v8  ;;  %v1526_v8 = vpack.c.bf16 %v1506_v34, %v1504_v28  ;;  %v1500_v22 = vmax.f32 %v1416_v32, 0.0  ;;  %v2737_v0 = vld [vmem:[%s3927_s1 + $0xd8] sm:$0xff]  ;;  %4041 = vst [vmem:[#allocation28_spill] sm:$0xff] %v3725_v4 }
 0x27c   : > { %v1514_v11 = vmax.f32 %v1433_v59, 0.0  ;;  %v2736_v59 = vld [vmem:[%s3927_s1 + $0xd0] sm:$0xff] }
 0x27d   : > { %v1515_v33 = vmax.f32 %v1482_v60, 0.0  ;;  %v1505_v13 = vmax.f32 %v1470_v51, 0.0  ;;  %v3727_v60 = vpop.f32.mrf.mxu3 }
 0x27e   : > { %v1530_v20 = vpack.c.bf16 %v1514_v11, %v1512_v36  ;;  %v1529_v11 = vpack.c.bf16 %v1511_v17, %v1509_v14  ;;  %4042 = vst [vmem:[#allocation30_spill] sm:$0xff] %v3727_v60  ;;  %v3755_v14 = vpop.permute.xlu0 %1742  ;;  %v3776_v28 = vpop.permute.xlu2 %1727 }
 0x27f   : > { %v1531_v6 = vpack.c.bf16 %v1515_v33, %v1513_v7  ;;  %v1465_v7 = vadd.f32 %v1464_v38, %v3618_v42  ;;  %v2614_v42 = vld [vmem:[%s3929_s3 + $0x8] sm:$0xf] }
 0x280   : > { %1564 = vmatpush.bf16.msra.mxu2 %v1530_v20  ;;  %v1502_v20 = vmax.f32 %v1418_v54, 0.0  ;;  %v2615_v38 = vor.u32 %v2730_v52, %v2614_v42 }
 0x281   : > { %1593 = vmatpush.bf16.msra.mxu3 %v1531_v6  ;;  %v1527_v6 = vpack.c.bf16 %v1507_v9, %v1505_v13  ;;  %v1501_v48 = vmax.f32 %v1465_v7, 0.0 }
 0x282   : > { %v1524_v27 = vpack.c.bf16 %v1502_v20, %v1500_v22  ;;  %v2741_v20 = vld [vmem:[%s3927_s1 + $0xf8] sm:$0xff] }
 0x283   : > { %v1525_v3 = vpack.c.bf16 %v1503_v40, %v1501_v48 }
 0x284   : > { %1565 = vmatpush.bf16.msra.mxu2 %v1528_v43  ;;  %v2740_v43 = vld [vmem:[%s3927_s1 + $0xf0] sm:$0xff] }
 0x285   : > { %1594 = vmatpush.bf16.msra.mxu3 %v1529_v11 }
 0x286   : > { %v1703_v22 = vpop.permute.xlu2 %1702 }
 0x288   : > { %1566 = vmatpush.bf16.msra.mxu2 %v1526_v8 }
 0x289   : > { %1595 = vmatpush.bf16.msra.mxu3 %v1527_v6 }
 0x28c   : > { %1567 = vmatpush.bf16.msra.mxu2 %v1524_v27 }
 0x28d   : > { %1596 = vmatpush.bf16.msra.mxu3 %v1525_v3 }
 0x290   : > { %1568 = vmatpush.bf16.msra.mxu2 %v3651_v37 }
 0x291   : > { %1597 = vmatpush.bf16.msra.mxu3 %v3653_v18  ;;  %v2734_v18 = vld [vmem:[%s3927_s1 + $0xc0] sm:$0xff] }
 0x294   : > { %1569 = vmatpush.bf16.msra.mxu2 %v3647_v58  ;;  %v2731_v58 = vld [vmem:[%s3929_s3 + $0x34] sm:$0xf0] }
 0x295   : > { %1598 = vmatpush.bf16.msra.mxu3 %v3649_v49  ;;  %v2733_v49 = vld [vmem:[%s3929_s3 + $0x74] sm:$0xf0] }
 0x298   : > { %1570 = vmatpush.bf16.msra.mxu2 %v3643_v35  ;;  %v2618_v35 = vld [vmem:[%s3929_s3 + $0x28] sm:$0xf] }
 0x299   : > { %1599 = vmatpush.bf16.msra.mxu3 %v3645_v63  ;;  %v2619_v63 = vor.u32 %v2731_v58, %v2618_v35 }
 0x29c   : > { %1571 = vmatpush.bf16.msra.mxu2 %v3639_v45  ;;  %v2622_v45 = vld [vmem:[%s3929_s3 + $0x48] sm:$0xf] }
 0x29d   : > { %1600 = vmatpush.bf16.msra.mxu3 %v3641_v12  ;;  %v2626_v12 = vld [vmem:[%s3929_s3 + $0x68] sm:$0xf] }
 0x29e   : > { %v2627_v37 = vor.u32 %v2733_v49, %v2626_v12 }
 0x29f   : > { %1572 = vmatmul.bf16.vlgmr.msra.gmra.mxu2 %v2615_v38 }
 0x2a0   : > { %1821 = vmatpush.bf16.msrb.mxu2 %v4034_v16  ;;  %1601 = vmatmul.bf16.vlgmr.msra.gmra.mxu3 %v2615_v38  ;;  %v2732_v16 = vld [vmem:[%s3929_s3 + $0x54] sm:$0xf0]  ;;  %v1698_v38 = vpop.permute.xlu2 %1697 }
 0x2a1   : > { %1870 = vmatpush.bf16.msrb.mxu3 %v4035_v1  ;;  %v2623_v1 = vor.u32 %v2732_v16, %v2622_v45 }
 0x2af   : > { %1577 = vmatmul.bf16.gmra.mxu2 %v2619_v63 }
 0x2b0   : > { %1606 = vmatmul.bf16.gmra.mxu3 %v2619_v63 }
 0x2bf   : > { %1582 = vmatmul.bf16.gmra.mxu2 %v2623_v1 }
 0x2c0   : > { %1611 = vmatmul.bf16.gmra.mxu3 %v2623_v1 }
 0x2cf   : > { %1587 = vmatmul.bf16.gmra.mxu2 %v2627_v37 }
 0x2d0   : > { %1616 = vmatmul.bf16.gmra.mxu3 %v2627_v37 }
 0x2df   : > { %2660 = vmatmul.msk.bf16.vlgmr.msrb.gmra.mxu2 %vm530_vm1, %v2734_v18 }
 0x2e0   : > { %2668 = vmatmul.msk.bf16.vlgmr.msrb.gmra.mxu3 %vm530_vm1, %v2734_v18 }
 0x2ef   : > { %2661 = vmatmul.msk.bf16.gmra.mxu2 %vm530_vm1, %v2735_v56 }
 0x2f0   : > { %2669 = vmatmul.msk.bf16.gmra.mxu3 %vm530_vm1, %v2735_v56 }
 0x2ff   : > { %2662 = vmatmul.msk.bf16.gmra.mxu2 %vm530_vm1, %v2736_v59 }
 0x300   : > { %2670 = vmatmul.msk.bf16.gmra.mxu3 %vm530_vm1, %v2736_v59 }
 0x30f   : > { %2663 = vmatmul.msk.bf16.gmra.mxu2 %vm530_vm1, %v2737_v0 }
 0x310   : > { %2671 = vmatmul.msk.bf16.gmra.mxu3 %vm530_vm1, %v2737_v0 }
 0x31f   : > { %2664 = vmatmul.msk.bf16.gmra.mxu2 %vm530_vm1, %v2738_v15 }
 0x320   : > { %2672 = vmatmul.msk.bf16.gmra.mxu3 %vm530_vm1, %v2738_v15 }
 0x322   : > { %v1573_v36 = vpop.f32.mrf.mxu2 }
 0x323   : > { %v3735_v33 = vadd.f32 %v1573_v36, %v3562_v5  ;;  %v1602_v29 = vpop.f32.mrf.mxu3 }
 0x324   : > { %v3738_v2 = vadd.f32 %v1602_v29, %v3564_v47 }
 0x32a   : > { %v3740_v19 = vpop.f32.mrf.mxu2 }
 0x32b   : > { %v3742_v17 = vpop.f32.mrf.mxu3 }
 0x32f   : > { %2665 = vmatmul.msk.bf16.gmra.mxu2 %vm530_vm1, %v2739_v10 }
 0x330   : > { %2673 = vmatmul.msk.bf16.gmra.mxu3 %vm530_vm1, %v2739_v10 }
 0x332   : > { %v1578_v39 = vpop.f32.mrf.mxu2 }
 0x333   : > { %v3750_v5 = vadd.f32 %v1578_v39, %v3579_v53  ;;  %v1607_v51 = vpop.f32.mrf.mxu3  ;;  %v3768_v53 = vpop.permute.xlu0 %1737 }
 0x334   : > { %v3753_v47 = vadd.f32 %v1607_v51, %v3581_v24 }
 0x33a   : > { %v3757_v54 = vpop.f32.mrf.mxu2 }
 0x33b   : > { %v3759_v34 = vpop.f32.mrf.mxu3  ;;  %v3785_v8 = vpop.permute.xlu0 %1712 }
 0x33f   : > { %2666 = vmatmul.msk.bf16.gmra.mxu2 %vm530_vm1, %v2740_v43 }
 0x340   : > { %2674 = vmatmul.msk.bf16.gmra.mxu3 %vm530_vm1, %v2740_v43 }
 0x342   : > { %v1583_v24 = vpop.f32.mrf.mxu2 }
 0x343   : > { %v3771_v9 = vadd.f32 %v1583_v24, %v3602_v21  ;;  %v1612_v11 = vpop.f32.mrf.mxu3  ;;  %v3789_v21 = vpop.permute.xlu1 %1747 }
 0x344   : > { %v3774_v32 = vadd.f32 %v1612_v11, %v3604_v44  ;;  %v1708_v27 = vpop.permute.xlu0 %1707 }
 0x34a   : > { %v3778_v7 = vpop.f32.mrf.mxu2 }
 0x34b   : > { %4043 = vst [vmem:[#allocation31_spill] sm:$0xff] %v3778_v7  ;;  %v3780_v13 = vpop.f32.mrf.mxu3  ;;  %v3801_v52 = vpop.permute.xlu1 %1722 }
 0x34c   : > { %4044 = vst [vmem:[#allocation20_spill] sm:$0xff] %v3780_v13  ;;  %v1683_v35 = vpop.permute.xlu0 %1682 }
 0x34f   : > { %2667 = vmatmul.msk.bf16.gmra.mxu2 %vm530_vm1, %v2741_v20 }
 0x350   : > { %2675 = vmatmul.msk.bf16.gmra.mxu3 %vm530_vm1, %v2741_v20 }
 0x352   : > { %v1588_v44 = vpop.f32.mrf.mxu2 }
 0x353   : > { %v3792_v40 = vadd.f32 %v1588_v44, %v3625_v62  ;;  %v1617_v6 = vpop.f32.mrf.mxu3  ;;  %v3803_v45 = vpop.permute.xlu1 %1717 }
 0x354   : > { %v3795_v48 = vadd.f32 %v1617_v6, %v3627_v25  ;;  %v1673_v62 = vpop.permute.xlu2 %1672  ;;  %v1678_v1 = vpop.permute.xlu0 %1677 }
 0x355   : > { %4045 = vst [vmem:[#allocation25_spill] sm:$0xff] %v3792_v40 }
 0x356   : > { %4046 = vst [vmem:[#allocation24_spill] sm:$0xff] %v3795_v48 }
 0x35a   : > { %v3797_v3 = vpop.f32.mrf.mxu2 }
 0x35b   : > { %4047 = vst [vmem:[#allocation21_spill] sm:$0xff] %v3797_v3  ;;  %v3799_v42 = vpop.f32.mrf.mxu3  ;;  %v1693_v29 = vpop.permute.xlu1 %1692 }
 0x35c   : > { %4048 = vst [vmem:[#allocation9_spill] sm:$0xff] %v3799_v42 }
 0x362   : > { %v1823_v58 = vpop.f32.mrf.mxu2 }
 0x363   : > { %v1872_v63 = vpop.f32.mrf.mxu3  ;;  %v1824_v16 = vadd.f32 %v1823_v58, %v1673_v62  ;;  %v1688_v24 = vpop.permute.xlu1 %1687 }
 0x364   : > { %v1873_v12 = vadd.f32 %v1872_v63, %v1673_v62 }
 0x365   : > { %v1912_v56 = vmax.f32 %v1824_v16, 0.0 }
 0x366   : > { %v1913_v0 = vmax.f32 %v1873_v12, 0.0 }
 0x36a   : > { %v1825_v49 = vpop.f32.mrf.mxu2 }
 0x36b   : > { %v1826_v25 = vadd.f32 %v1825_v49, %v1678_v1  ;;  %v1874_v37 = vpop.f32.mrf.mxu3 }
 0x36c   : > { %v1875_v18 = vadd.f32 %v1874_v37, %v1678_v1 }
 0x36d   : > { %v1914_v59 = vmax.f32 %v1826_v25, 0.0 }
 0x36e   : > { %v1915_v15 = vmax.f32 %v1875_v18, 0.0 }
 0x36f   : > { %v3805_v36 = vpack.c.bf16 %v1914_v59, %v1912_v56 }
 0x370   : > { %v3807_v10 = vpack.c.bf16 %v1915_v15, %v1913_v0 }
 0x372   : > { %v1828_v39 = vpop.f32.mrf.mxu2 }
 0x373   : > { %v1877_v51 = vpop.f32.mrf.mxu3  ;;  %v1829_v43 = vadd.f32 %v1828_v39, %v1683_v35 }
 0x374   : > { %v1878_v11 = vadd.f32 %v1877_v51, %v1683_v35 }
 0x375   : > { %v1916_v63 = vmax.f32 %v1829_v43, 0.0 }
 0x376   : > { %v1917_v16 = vmax.f32 %v1878_v11, 0.0 }
 0x37a   : > { %v1830_v20 = vpop.f32.mrf.mxu2 }
 0x37b   : > { %v1831_v44 = vadd.f32 %v1830_v20, %v1688_v24  ;;  %v1879_v6 = vpop.f32.mrf.mxu3 }
 0x37c   : > { %v1880_v58 = vadd.f32 %v1879_v6, %v1688_v24 }
 0x37d   : > { %v1918_v62 = vmax.f32 %v1831_v44, 0.0 }
 0x37e   : > { %v1919_v1 = vmax.f32 %v1880_v58, 0.0 }
 0x37f   : > { %v3809_v12 = vpack.c.bf16 %v1918_v62, %v1916_v63 }
 0x380   : > { %v3811_v49 = vpack.c.bf16 %v1919_v1, %v1917_v16 }
 0x382   : > { %v1833_v25 = vpop.f32.mrf.mxu2 }
 0x383   : > { %v1882_v37 = vpop.f32.mrf.mxu3  ;;  %v1834_v18 = vadd.f32 %v1833_v25, %v1693_v29 }
 0x384   : > { %v1883_v56 = vadd.f32 %v1882_v37, %v1693_v29 }
 0x385   : > { %v1920_v39 = vmax.f32 %v1834_v18, 0.0 }
 0x386   : > { %v1921_v20 = vmax.f32 %v1883_v56, 0.0 }
 0x38a   : > { %v1835_v59 = vpop.f32.mrf.mxu2 }
 0x38b   : > { %v1836_v0 = vadd.f32 %v1835_v59, %v1698_v38  ;;  %v1884_v15 = vpop.f32.mrf.mxu3 }
 0x38c   : > { %v1885_v35 = vadd.f32 %v1884_v15, %v1698_v38 }
 0x38d   : > { %v1922_v51 = vmax.f32 %v1836_v0, 0.0 }
 0x38e   : > { %v1923_v24 = vmax.f32 %v1885_v35, 0.0 }
 0x38f   : > { %v3813_v43 = vpack.c.bf16 %v1922_v51, %v1920_v39 }
 0x390   : > { %v3815_v11 = vpack.c.bf16 %v1923_v24, %v1921_v20 }
 0x392   : > { %v1838_v44 = vpop.f32.mrf.mxu2 }
 0x393   : > { %v1887_v6 = vpop.f32.mrf.mxu3  ;;  %v1839_v58 = vadd.f32 %v1838_v44, %v1703_v22 }
 0x394   : > { %v1888_v63 = vadd.f32 %v1887_v6, %v1703_v22 }
 0x395   : > { %v1924_v25 = vmax.f32 %v1839_v58, 0.0 }
 0x396   : > { %v1925_v59 = vmax.f32 %v1888_v63, 0.0 }
 0x39a   : > { %v1840_v62 = vpop.f32.mrf.mxu2 }
 0x39b   : > { %v1841_v16 = vadd.f32 %v1840_v62, %v1708_v27  ;;  %v1889_v1 = vpop.f32.mrf.mxu3 }
 0x39c   : > { %v1890_v29 = vadd.f32 %v1889_v1, %v1708_v27 }
 0x39d   : > { %v1926_v37 = vmax.f32 %v1841_v16, 0.0 }
 0x39e   : > { %v1927_v38 = vmax.f32 %v1890_v29, 0.0 }
 0x39f   : > { %v3817_v18 = vpack.c.bf16 %v1926_v37, %v1924_v25 }
 0x3a0   : > { %v3819_v56 = vpack.c.bf16 %v1927_v38, %v1925_v59 }
 0x3a2   : > { %v1843_v0 = vpop.f32.mrf.mxu2 }
 0x3a3   : > { %v1892_v15 = vpop.f32.mrf.mxu3 }
 0x3aa   : > { %v1845_v35 = vpop.f32.mrf.mxu2 }
 0x3ab   : > { %v1894_v39 = vpop.f32.mrf.mxu3 }
 0x3b2   : > { %v1848_v51 = vpop.f32.mrf.mxu2 }
 0x3b3   : > { %v1897_v20 = vpop.f32.mrf.mxu3 }
 0x3ba   : > { %v1850_v24 = vpop.f32.mrf.mxu2 }
 0x3bb   : > { %v1899_v22 = vpop.f32.mrf.mxu3 }
 0x3c2   : > { %v1853_v44 = vpop.f32.mrf.mxu2 }
 0x3c3   : > { %v1902_v6 = vpop.f32.mrf.mxu3  ;;  %v1854_v3 = vadd.f32 %v1853_v44, %v3765_v30 }
 0x3c4   : > { %v1903_v48 = vadd.f32 %v1902_v6, %v3765_v30  ;;  %v1846_v30 = vadd.f32 %v1845_v35, %v3803_v45 }
 0x3c6   : > { %v1937_v44 = vmax.f32 %v1903_v48, 0.0 }
 0x3ca   : > { %v1855_v62 = vpop.f32.mrf.mxu2 }
 0x3cb   : > { %v1904_v27 = vpop.f32.mrf.mxu3  ;;  %v1856_v25 = vadd.f32 %v1855_v62, %v3768_v53  ;;  %v1900_v62 = vadd.f32 %v1899_v22, %v3776_v28  ;;  %v2077_v22 = vpop.permute.xlu1 %2076 }
 0x3cc   : > { %v1905_v38 = vadd.f32 %v1904_v27, %v3768_v53  ;;  %v1849_v53 = vadd.f32 %v1848_v51, %v3801_v52  ;;  %v1936_v27 = vmax.f32 %v1854_v3, 0.0 }
 0x3d2   : > { %v1858_v58 = vpop.f32.mrf.mxu2 }
 0x3d3   : > { %v1907_v16 = vpop.f32.mrf.mxu3  ;;  %v1859_v63 = vadd.f32 %v1858_v58, %v3755_v14 }
 0x3d4   : > { %v1908_v1 = vadd.f32 %v1907_v16, %v3755_v14  ;;  %v1851_v14 = vadd.f32 %v1850_v24, %v3776_v28  ;;  %v1938_v16 = vmax.f32 %v1856_v25, 0.0  ;;  %v1895_v24 = vadd.f32 %v1894_v39, %v3803_v45 }
 0x3d5   : > { %v1940_v60 = vmax.f32 %v1859_v63, 0.0  ;;  %v1935_v63 = vmax.f32 %v1900_v62, 0.0  ;;  %v1932_v28 = vmax.f32 %v1849_v53, 0.0 }
 0x3d6   : > { %v1941_v40 = vmax.f32 %v1908_v1, 0.0  ;;  %v1934_v6 = vmax.f32 %v1851_v14, 0.0  ;;  %v1931_v48 = vmax.f32 %v1895_v24, 0.0  ;;  %v1164_v14 = vadd.f32 %v3568_v31, %v3570_v23 }
 0x3d8   : > { %v1624_v62 = vadd.f32 %v3740_v19, %v1164_v14 }
 0x3da   : > { %v1860_v29 = vpop.f32.mrf.mxu2 }
 0x3db   : > { %v1861_v37 = vadd.f32 %v1860_v29, %v3789_v21  ;;  %v1909_v59 = vpop.f32.mrf.mxu3  ;;  %v1939_v29 = vmax.f32 %v1905_v38, 0.0  ;;  %v2087_v38 = vpop.permute.xlu0 %2086 }
 0x3dc   : > { %v1910_v42 = vadd.f32 %v1909_v59, %v3789_v21  ;;  %v1898_v21 = vadd.f32 %v1897_v20, %v3801_v52  ;;  %v1954_v52 = vpack.c.bf16 %v1934_v6, %v1932_v28  ;;  %v2092_v6 = vpop.permute.xlu1 %2091 }
 0x3dd   : > { %v1942_v4 = vmax.f32 %v1861_v37, 0.0  ;;  %v2082_v37 = vpop.permute.xlu2 %2081 }
 0x3de   : > { %v1943_v58 = vmax.f32 %v1910_v42, 0.0  ;;  %v1956_v42 = vpack.c.bf16 %v1938_v16, %v1936_v27  ;;  %v1933_v3 = vmax.f32 %v1898_v21, 0.0  ;;  %v1193_v16 = vadd.f32 %v3572_v55, %v3574_v57 }
 0x3df   : > { %v1958_v13 = vpack.c.bf16 %v1942_v4, %v1940_v60  ;;  %v1957_v4 = vpack.c.bf16 %v1939_v29, %v1937_v44  ;;  %v1844_v60 = vadd.f32 %v1843_v0, %v3785_v8  ;;  %v2742_v0 = vld [vmem:[%s3929_s3 + $0x18] sm:$0xf0] }
 0x3e0   : > { %v1959_v7 = vpack.c.bf16 %v1943_v58, %v1941_v40  ;;  %v1893_v40 = vadd.f32 %v1892_v15, %v3785_v8  ;;  %v2678_v8 = vld [vmem:[%s3929_s3 + $0xc] sm:$0xf]  ;;  %v1625_v53 = vadd.f32 %v3742_v17, %v1193_v16 }
 0x3e1   : > { %1992 = vmatpush.bf16.msrb.mxu0 %v1958_v13  ;;  %v1930_v13 = vmax.f32 %v1846_v30, 0.0  ;;  %v1928_v51 = vmax.f32 %v1844_v60, 0.0  ;;  %v2679_v15 = vor.u32 %v2742_v0, %v2678_v8  ;;  %v1198_v0 = vadd.f32 %v3591_v61, %v3593_v26 }
 0x3e2   : > { %2021 = vmatpush.bf16.msrb.mxu1 %v1959_v7  ;;  %v1955_v7 = vpack.c.bf16 %v1935_v63, %v1933_v3  ;;  %v1929_v35 = vmax.f32 %v1893_v40, 0.0 }
 0x3e3   : > { %v1952_v20 = vpack.c.bf16 %v1930_v13, %v1928_v51  ;;  %v2162_v23 = vpop.permute.xlu0 %2161 }
 0x3e4   : > { %v1953_v45 = vpack.c.bf16 %v1931_v48, %v1929_v35  ;;  %v2097_v51 = vpop.permute.xlu1 %2096 }
 0x3e5   : > { %1993 = vmatpush.bf16.msrb.mxu0 %v1956_v42 }
 0x3e6   : > { %2022 = vmatpush.bf16.msrb.mxu1 %v1957_v4 }
 0x3e9   : > { %1994 = vmatpush.bf16.msrb.mxu0 %v1954_v52 }
 0x3ea   : > { %2023 = vmatpush.bf16.msrb.mxu1 %v1955_v7 }
 0x3ed   : > { %1995 = vmatpush.bf16.msrb.mxu0 %v1952_v20  ;;  %v1169_v20 = vadd.f32 %v3587_v41, %v3589_v50  ;;  %v2102_v41 = vpop.permute.xlu0 %2101 }
 0x3ee   : > { %2024 = vmatpush.bf16.msrb.mxu1 %v1953_v45 }
 0x3f1   : > { %1996 = vmatpush.bf16.msrb.mxu0 %v3817_v18  ;;  %v2690_v18 = vld [vmem:[%s3929_s3 + $0x6c] sm:$0xf] }
 0x3f2   : > { %2025 = vmatpush.bf16.msrb.mxu1 %v3819_v56  ;;  %v2745_v56 = vld [vmem:[%s3929_s3 + $0x78] sm:$0xf0] }
 0x3f3   : > { %v2691_v39 = vor.u32 %v2745_v56, %v2690_v18 }
 0x3f5   : > { %1997 = vmatpush.bf16.msrb.mxu0 %v3813_v43  ;;  %v2743_v43 = vld [vmem:[%s3929_s3 + $0x38] sm:$0xf0] }
 0x3f6   : > { %2026 = vmatpush.bf16.msrb.mxu1 %v3815_v11 }
 0x3f9   : > { %1998 = vmatpush.bf16.msrb.mxu0 %v3809_v12  ;;  %v2682_v12 = vld [vmem:[%s3929_s3 + $0x2c] sm:$0xf] }
 0x3fa   : > { %2027 = vmatpush.bf16.msrb.mxu1 %v3811_v49  ;;  %v2683_v11 = vor.u32 %v2743_v43, %v2682_v12  ;;  %v2686_v49 = vld [vmem:[%s3929_s3 + $0x4c] sm:$0xf]  ;;  %v1628_v12 = vadd.f32 %v3757_v54, %v1169_v20 }
 0x3fd   : > { %1999 = vmatpush.bf16.msrb.mxu0 %v3805_v36  ;;  %v2744_v36 = vld [vmem:[%s3929_s3 + $0x58] sm:$0xf0] }
 0x3fe   : > { %2028 = vmatpush.bf16.msrb.mxu1 %v3807_v10  ;;  %v2687_v10 = vor.u32 %v2744_v36, %v2686_v49 }
 0x400   : > { %2000 = vmatmul.bf16.vlgmr.msrb.gmra.mxu0 %v2679_v15 }
 0x401   : > { %2029 = vmatmul.bf16.vlgmr.msrb.gmra.mxu1 %v2679_v15 }
 0x410   : > { %2005 = vmatmul.bf16.gmra.mxu0 %v2683_v11 }
 0x411   : > { %2034 = vmatmul.bf16.gmra.mxu1 %v2683_v11 }
 0x420   : > { %2010 = vmatmul.bf16.gmra.mxu0 %v2687_v10 }
 0x421   : > { %2039 = vmatmul.bf16.gmra.mxu1 %v2687_v10 }
 0x430   : > { %2015 = vmatmul.bf16.gmra.mxu0 %v2691_v39 }
 0x431   : > { %2044 = vmatmul.bf16.gmra.mxu1 %v2691_v39 }
 0x47d   : > { %v2001_v1 = vpop.f32.mrf.mxu0 }
 0x47e   : > { %v2030_v25 = vpop.f32.mrf.mxu1  ;;  %v2050_v59 = vadd.f32 %v2001_v1, %v3735_v33  ;;  %v2172_v1 = vpop.permute.xlu1 %2171 }
 0x47f   : > { %v2051_v58 = vadd.f32 %v2030_v25, %v3738_v2  ;;  %v2157_v2 = vpop.permute.xlu2 %2156 }
 0x480   : > { %v2114_v29 = vadd.f32 %v2077_v22, %v2050_v59 }
 0x481   : > { %v2115_v27 = vadd.f32 %v2077_v22, %v2051_v58 }
 0x482   : > { %v2130_v42 = vmax.f32 %v2114_v29, 0.0  ;;  %v4049_v29 = vld [vmem:[#allocation37_spill] sm:$0xff] }
 0x483   : > { %v2131_v63 = vmax.f32 %v2115_v27, 0.0 }
 0x484   : > { %v2194_v55 = vmul.f32 %v2157_v2, %v2130_v42  ;;  %v4052_v42 = vld [vmem:[#allocation31_spill] sm:$0xff] }
 0x485   : > { %v2003_v21 = vpop.f32.mrf.mxu0  ;;  %v2195_v19 = vmul.f32 %v2157_v2, %v2131_v63 }
 0x486   : > { %v2052_v44 = vadd.f32 %v2003_v21, %v1624_v62  ;;  %v2032_v30 = vpop.f32.mrf.mxu1  ;;  %v2177_v21 = vpop.permute.xlu0 %2176 }
 0x487   : > { %v2053_v33 = vadd.f32 %v2032_v30, %v1625_v53  ;;  %v2167_v8 = vpop.permute.xlu2 %2166  ;;  %v1174_v53 = vadd.f32 %v4049_v29, %v3612_v46  ;;  %v4051_v30 = vld [vmem:[#allocation22_spill] sm:$0xff] }
 0x488   : > { %v2116_v24 = vadd.f32 %v2082_v37, %v2052_v44  ;;  %v4050_v44 = vld [vmem:[#allocation34_spill] sm:$0xff] }
 0x489   : > { %v2117_v4 = vadd.f32 %v2082_v37, %v2053_v33 }
 0x48a   : > { %v2132_v31 = vmax.f32 %v2116_v24, 0.0  ;;  %v1632_v24 = vadd.f32 %v4052_v42, %v1174_v53 }
 0x48b   : > { %v2133_v60 = vmax.f32 %v2117_v4, 0.0 }
 0x48c   : > { %v2196_v57 = vmul.f32 %v2162_v23, %v2132_v31 }
 0x48d   : > { %v2197_v28 = vmul.f32 %v2162_v23, %v2133_v60  ;;  %v2006_v40 = vpop.f32.mrf.mxu0 }
 0x48e   : > { %v2210_v17 = vadd.f32 %v2196_v57, %v2194_v55  ;;  %v2054_v3 = vadd.f32 %v2006_v40, %v3750_v5  ;;  %v2035_v13 = vpop.f32.mrf.mxu1  ;;  %v1629_v5 = vadd.f32 %v3759_v34, %v1198_v0 }
 0x48f   : > { %v2223_v52 = vadd.f32 %v2197_v28, %v2195_v19  ;;  %v2055_v48 = vadd.f32 %v2035_v13, %v3753_v47  ;;  %v2107_v16 = vpop.permute.xlu2 %2106 }
 0x490   : > { %v2118_v7 = vadd.f32 %v2087_v38, %v2054_v3 }
 0x491   : > { %v2119_v35 = vadd.f32 %v2087_v38, %v2055_v48 }
 0x492   : > { %v2134_v45 = vmax.f32 %v2118_v7, 0.0  ;;  %v4054_v7 = vld [vmem:[#allocation25_spill] sm:$0xff] }
 0x493   : > { %v2135_v15 = vmax.f32 %v2119_v35, 0.0 }
 0x494   : > { %v2198_v43 = vmul.f32 %v2167_v8, %v2134_v45  ;;  %v4055_v45 = vld [vmem:[#allocation24_spill] sm:$0xff] }
 0x495   : > { %v2199_v11 = vmul.f32 %v2167_v8, %v2135_v15  ;;  %v2008_v49 = vpop.f32.mrf.mxu0  ;;  %v2112_v15 = vpop.permute.xlu1 %2111 }
 0x496   : > { %v2211_v47 = vadd.f32 %v2210_v17, %v2198_v43  ;;  %v2056_v36 = vadd.f32 %v2008_v49, %v1628_v12  ;;  %v2037_v10 = vpop.f32.mrf.mxu1  ;;  %v4056_v43 = vld [vmem:[#allocation14_spill] sm:$0xff] }
 0x497   : > { %v2224_v18 = vadd.f32 %v2223_v52, %v2199_v11  ;;  %v2057_v56 = vadd.f32 %v2037_v10, %v1629_v5  ;;  %v2182_v40 = vpop.permute.xlu2 %2181  ;;  %v4057_v5 = vld [vmem:[#allocation28_spill] sm:$0xff]  ;;  %v4059_v10 = vld [vmem:[#allocation30_spill] sm:$0xff] }
 0x498   : > { %v2120_v39 = vadd.f32 %v2092_v6, %v2056_v36  ;;  %v1179_v11 = vadd.f32 %v4057_v5, %v4056_v43  ;;  %v4058_v36 = vld [vmem:[#allocation35_spill] sm:$0xff] }
 0x499   : > { %v2121_v50 = vadd.f32 %v2092_v6, %v2057_v56  ;;  %v1203_v6 = vadd.f32 %v4051_v30, %v4050_v44 }
 0x49a   : > { %v2136_v22 = vmax.f32 %v2120_v39, 0.0  ;;  %v4060_v39 = vld [vmem:[#allocation21_spill] sm:$0xff] }
 0x49b   : > { %v2137_v25 = vmax.f32 %v2121_v50, 0.0 }
 0x49c   : > { %v2200_v61 = vmul.f32 %v2172_v1, %v2136_v22  ;;  %v4061_v22 = vld [vmem:[#allocation9_spill] sm:$0xff] }
 0x49d   : > { %v2201_v26 = vmul.f32 %v2172_v1, %v2137_v25  ;;  %v2011_v37 = vpop.f32.mrf.mxu0 }
 0x49e   : > { %v2212_v54 = vadd.f32 %v2211_v47, %v2200_v61  ;;  %v2058_v59 = vadd.f32 %v2011_v37, %v3771_v9  ;;  %v2040_v34 = vpop.f32.mrf.mxu1  ;;  %v4053_v9 = vld [vmem:[#allocation20_spill] sm:$0xff]  ;;  %v2187_v47 = vpop.permute.xlu0 %2186 }
 0x49f   : > { %v2225_v38 = vadd.f32 %v2224_v18, %v2201_v26  ;;  %v2059_v58 = vadd.f32 %v2040_v34, %v3774_v32  ;;  %v1633_v63 = vadd.f32 %v4053_v9, %v1203_v6  ;;  %v1208_v18 = vadd.f32 %v4059_v10, %v4058_v36 }
 0x4a0   : > { %v2122_v14 = vadd.f32 %v2097_v51, %v2058_v59 }
 0x4a1   : > { %v2123_v62 = vadd.f32 %v2097_v51, %v2059_v58  ;;  %v1637_v1 = vadd.f32 %v4061_v22, %v1208_v18 }
 0x4a2   : > { %v2138_v27 = vmax.f32 %v2122_v14, 0.0 }
 0x4a3   : > { %v2139_v33 = vmax.f32 %v2123_v62, 0.0 }
 0x4a4   : > { %v2202_v2 = vmul.f32 %v2177_v21, %v2138_v27 }
 0x4a5   : > { %v2203_v4 = vmul.f32 %v2177_v21, %v2139_v33  ;;  %v2013_v31 = vpop.f32.mrf.mxu0 }
 0x4a6   : > { %v2213_v32 = vadd.f32 %v2212_v54, %v2202_v2  ;;  %v2060_v23 = vadd.f32 %v2013_v31, %v1632_v24  ;;  %v2042_v60 = vpop.f32.mrf.mxu1 }
 0x4a7   : > { %v2226_v55 = vadd.f32 %v2225_v38, %v2203_v4  ;;  %v2061_v57 = vadd.f32 %v2042_v60, %v1633_v63  ;;  %v2237_v4 = vstv %s2236_s13 }
 0x4a8   : > { %v2124_v19 = vadd.f32 %v2102_v41, %v2060_v23 }
 0x4a9   : > { %v2125_v46 = vadd.f32 %v2102_v41, %v2061_v57  ;;  %v1636_v41 = vadd.f32 %v4060_v39, %v1179_v11  ;;  %v2284_v11 = vlaneseq }
 0x4aa   : > { %v2140_v28 = vmax.f32 %v2124_v19, 0.0 }
 0x4ab   : > { %v2141_v17 = vmax.f32 %v2125_v46, 0.0  ;;  %vm2286_vm12 = vcmp.lt.s32.totalorder %v2284_v11, 256 }
 0x4ac   : > { %v2204_v3 = vmul.f32 %v2182_v40, %v2140_v28 }
 0x4ad   : > { %v2205_v13 = vmul.f32 %v2182_v40, %v2141_v17  ;;  %v2016_v52 = vpop.f32.mrf.mxu0 }
 0x4ae   : > { %v2214_v48 = vadd.f32 %v2213_v32, %v2204_v3  ;;  %v2062_v51 = vadd.f32 %v2016_v52, %v4054_v7  ;;  %v2045_v35 = vpop.f32.mrf.mxu1 }
 0x4af   : > { %v2227_v20 = vadd.f32 %v2226_v55, %v2205_v13  ;;  %v2063_v8 = vadd.f32 %v2045_v35, %v4055_v45 }
 0x4b0   : > { %v2126_v0 = vadd.f32 %v2107_v16, %v2062_v51 }
 0x4b1   : > { %v2127_v12 = vadd.f32 %v2107_v16, %v2063_v8  ;;  %v2192_v16 = vpop.permute.xlu1 %2191 }
 0x4b2   : > { %v2142_v49 = vmax.f32 %v2126_v0, 0.0 }
 0x4b3   : > { %v2143_v56 = vmax.f32 %v2127_v12, 0.0 }
 0x4b4   : > { %v2206_v50 = vmul.f32 %v2187_v47, %v2142_v49 }
 0x4b5   : > { %v2207_v25 = vmul.f32 %v2187_v47, %v2143_v56  ;;  %v2018_v61 = vpop.f32.mrf.mxu0 }
 0x4b6   : > { %v2215_v26 = vadd.f32 %v2214_v48, %v2206_v50  ;;  %v2064_v37 = vadd.f32 %v2018_v61, %v1636_v41  ;;  %v2047_v54 = vpop.f32.mrf.mxu1 }
 0x4b7   : > { %v2228_v59 = vadd.f32 %v2227_v20, %v2207_v25  ;;  %v2065_v34 = vadd.f32 %v2047_v54, %v1637_v1  ;;  %v4064_v1 = vld [vmem:[#allocation3_spill] sm:$0xff] }
 0x4b8   : > { %v2128_v38 = vadd.f32 %v2112_v15, %v2064_v37 }
 0x4b9   : > { %v2129_v58 = vadd.f32 %v2112_v15, %v2065_v34 }
 0x4ba   : > { %v2144_v14 = vmax.f32 %v2128_v38, 0.0 }
 0x4bb   : > { %v2145_v62 = vmax.f32 %v2129_v58, 0.0 }
 0x4bc   : > { %v2208_v29 = vmul.f32 %v2192_v16, %v2144_v14 }
 0x4bd   : > { %v2209_v53 = vmul.f32 %v2192_v16, %v2145_v62 }
 0x4be   : > { %v2216_v27 = vadd.f32 %v2215_v26, %v2208_v29 }
 0x4bf   : > { %v2229_v21 = vadd.f32 %v2228_v59, %v2209_v53 }
 0x4c0   : > { %v2217_v44 = vrot.slane %v2216_v27, 4 }
 0x4c1   : > { %v2230_v30 = vrot.slane %v2229_v21, 4 }
 0x4c2   : > { %v2218_v6 = vadd.f32 %v2217_v44, %v2216_v27 }
 0x4c3   : > { %v2231_v33 = vadd.f32 %v2230_v30, %v2229_v21 }
 0x4c4   : > { %v2219_v42 = vrot.slane %v2218_v6, 2 }
 0x4c5   : > { %v2232_v24 = vrot.slane %v2231_v33, 2 }
 0x4c6   : > { %v2220_v2 = vadd.f32 %v2219_v42, %v2218_v6 }
 0x4c7   : > { %v2233_v9 = vadd.f32 %v2232_v24, %v2231_v33 }
 0x4c8   : > { %v2221_v63 = vrot.slane %v2220_v2, 1 }
 0x4c9   : > { %v2234_v31 = vrot.slane %v2233_v9, 1 }
 0x4ca   : > { %v2222_v32 = vadd.f32 %v2221_v63, %v2220_v2 }
 0x4cb   : > { %v2235_v23 = vadd.f32 %v2234_v31, %v2233_v9 }
 0x4cc   : > { %v2238_v60 = vadd.f32 %v2237_v4, %v2222_v32 }
 0x4cd   : > { %v2239_v55 = vadd.f32 %v2237_v4, %v2235_v23 }
 0x4ce   : > { %v2692_v57 = vmul.f32 -1.442695, %v2238_v60 }
 0x4cf   : > { %v2693_v19 = vmul.f32 -1.442695, %v2239_v55 }
 0x4d0   : > { %2774 = vpow2.f32 %v2692_v57 }
 0x4d1   : > { %2776 = vpow2.f32 %v2693_v19 }
 0x4d6   : > { %v2775_v46 = vpop.eup %2774 }
 0x4d7   : > { %v2777_v28 = vpop.eup %2776  ;;  %v2246_v40 = vadd.f32 1.0, %v2775_v46 }
 0x4d8   : > { %v2247_v17 = vadd.f32 1.0, %v2777_v28 }
 0x4d9   : > { %2778 = vrcp.f32 %v2246_v40  ;;  %vm2253_vm4 = vweird.f32 %v2246_v40  ;;  %v2259_v15 = vand.u32 2147483648, %v2246_v40  ;;  %v2257_v43 = vand.u32 2147483647, %v2246_v40 }
 0x4da   : > { %2780 = vrcp.f32 %v2247_v17  ;;  %v2274_v20 = vand.u32 2147483648, %v2247_v17  ;;  %v2272_v8 = vand.u32 2147483647, %v2247_v17  ;;  %vm2268_vm6 = vweird.f32 %v2247_v17 }
 0x4db   : > { %v2260_v10 = vor.u32 1.1754944e-38, %v2259_v15  ;;  %vm2258_vm11 = vcmp.eq.f32.partialorder %v2257_v43, 8.507059e+37 }
 0x4dc   : > { %v2275_v49 = vor.u32 1.1754944e-38, %v2274_v20  ;;  %vm2273_vm8 = vcmp.eq.f32.partialorder %v2272_v8, 8.507059e+37 }
 0x4df   : > { %v2779_v3 = vpop.eup %2778 }
 0x4e0   : > { %v2781_v13 = vpop.eup %2780  ;;  %v2249_v52 = vmul.f32 %v2779_v3, %v2246_v40  ;;  %vm2254_vm2 = vweird.f32 %v2779_v3 }
 0x4e1   : > { %v2264_v48 = vmul.f32 %v2781_v13, %v2247_v17  ;;  %vm2269_vm3 = vweird.f32 %v2781_v13  ;;  %vm3901_vm5 = vmor %vm2253_vm4, %vm2254_vm2 }
 0x4e2   : > { %v2250_v7 = vsub.f32 1.0, %v2249_v52  ;;  %vm2270_vm7 = vmor %vm2268_vm6, %vm2269_vm3 }
 0x4e3   : > { %v2265_v51 = vsub.f32 1.0, %v2264_v48 }
 0x4e4   : > { %v2251_v35 = vmul.f32 %v2779_v3, %v2250_v7 }
 0x4e5   : > { %v2266_v45 = vmul.f32 %v2781_v13, %v2265_v51 }
 0x4e6   : > { %v2252_v0 = vadd.f32 %v2779_v3, %v2251_v35 }
 0x4e7   : > { %v2267_v5 = vadd.f32 %v2781_v13, %v2266_v45 }
 0x4e8   : > { %v2256_v47 = vsel %vm3901_vm5, %v2779_v3, %v2252_v0 }
 0x4e9   : > { %v2271_v36 = vsel %vm2270_vm7, %v2781_v13, %v2267_v5  ;;  %v2261_v41 = vsel %vm2258_vm11, %v2260_v10, %v2256_v47 }
 0x4ea   : > { %v2276_v18 = vsel %vm2273_vm8, %v2275_v49, %v2271_v36 }
 0x4eb   : > { %v2280_v56 = vrot.slane %v2276_v18, 7  ;;  %v2289_v39 = vrot.slane %v2276_v18, 4 }
 0x4ed   : > { %v2282_v50 = vsel %vm2281_vm9, %v2261_v41, %v2280_v56  ;;  %v2291_v22 = vsel %vm2290_vm10, %v2261_v41, %v2289_v39 }
 0x4ee   : > { %2288 = vst.msk [vmem:[%s366_s18] sm:$0x3] %vm2286_vm12, %v2282_v50  ;;  %v2293_v25 = vmul.f32 %v2291_v22, %v4064_v1 }
 0x4f0   : > { %2294 = vst [vmem:[%s357_s21] sm:$0xff] %v2293_v25 }
 0x4f1 PF: > { %s20_s9 = sadd.s32 1, %s2804_s9   ;;  %s4065_s29 = smov %s2800_s30 }
 0x4f2   : > { %p17_p5 = scmp.ge.s32.totalorder %s20_s9, 4   ;;  %s4066_s30 = smov %s4068_s6 }
 0x4f4   :  { %19 = sbr.rel (!%p17_p5) target bundleno = 2 (0x2), region = 90 }

</bundles_post_ra>
